<compile_context>
chip_gen: v6e
topology: v6e:2x2x1
jax: 0.10.0
libtpu: 0.0.40
codegen_flags: <defaults>
</compile_context>

<pallas_src>
import functools

import jax
import jax.numpy as jnp
from jax import lax
from jax.experimental import pallas as pl
from jax.experimental.pallas import tpu as pltpu

LEAKY_SLOPE = 0.01  # PyTorch LeakyReLU default negative_slope


def _round_up(x, m):
    return (x + m - 1) // m * m


def _conv_relu_kernel(x_ref, w_ref, b_ref, o_ref, *, tile_h, w_out, apply_relu):
    # x_ref : (1, H_pad+2, W_pad+2, Cin)  bf16 padded image, resident across row tiles
    # w_ref : (3, 3, Cin, Cout)           bf16 conv weights (HWIO)
    # b_ref : (1, Cout)                   f32 bias
    # o_ref : (1, tile_h, W_pad, Cout)    output tile (logical Cout, no lane padding)
    cin = x_ref.shape[-1]
    cout = o_ref.shape[-1]
    m = tile_h * w_out
    r0 = pl.program_id(1) * tile_h  # first output row of this tile (in padded coords)

    acc = jnp.zeros((m, cout), jnp.float32)
    for kw in range(3):
        # Halo rows [r0, r0 + tile_h + 2), output columns shifted by kw.
        # Row start is a cheap major-axis dynamic offset; kw is a static slice.
        x_kw = x_ref[0, pl.ds(r0, tile_h + 2), pl.ds(kw, w_out), :]  # (tile_h+2, w_out, cin)
        for kh in range(3):
            # Major-axis slice of an in-register value; reshape is layout-preserving
            # because w_out is a multiple of 8 (sublane tiling).
            tap = x_kw[kh:kh + tile_h].reshape(m, cin)
            acc = acc + jnp.dot(tap, w_ref[kh, kw],
                                preferred_element_type=jnp.float32)

    acc = acc + b_ref[...]  # fused bias, broadcast over rows
    if apply_relu:
        acc = jnp.where(acc >= 0, acc, LEAKY_SLOPE * acc)  # LeakyReLU(0.01)

    o_ref[0] = acc.reshape(tile_h, w_out, cout).astype(o_ref.dtype)


def conv_relu(x_nchw, weight_oihw, bias, *, init_zero=False,
              compute_dtype=jnp.bfloat16, target_block_pixels=2048):
    """ConvRelu forward (matches the PyTorch module, stride=1, padding=1).

    x_nchw      : (N, Cin, H, W)  activations (PyTorch NCHW layout)
    weight_oihw : (Cout, Cin, 3, 3)  Conv2d weight
    bias        : (Cout,)
    init_zero   : True  -> module is a plain Conv2d (no activation)
                  False -> Conv2d followed by LeakyReLU(0.01)
    Returns (N, Cout, H, W) in x_nchw.dtype.
    """
    N, Cin, H, W = x_nchw.shape
    Cout = weight_oihw.shape[0]
    out_dtype = x_nchw.dtype

    # ---------------- wrapper-side layout glue (single XLA pass) ----------------
    x_nhwc = jnp.transpose(x_nchw, (0, 2, 3, 1))  # (N, H, W, Cin)

    # W padded up to a multiple of 8 so in-kernel reshapes stay layout-preserving;
    # extra right columns are zeros and the corresponding outputs are sliced off.
    w_pad_dim = _round_up(W, 8)
    tile_h = max(1, min(H, target_block_pixels // w_pad_dim))
    h_pad_dim = _round_up(H, tile_h)
    n_row_tiles = h_pad_dim // tile_h

    x_pad = jnp.pad(
        x_nhwc,
        ((0, 0),
         (1, 1 + (h_pad_dim - H)),
         (1, 1 + (w_pad_dim - W)),
         (0, 0)),
    ).astype(compute_dtype)  # (N, H_pad+2, W_pad+2, Cin)

    w_hwio = jnp.transpose(weight_oihw, (2, 3, 1, 0)).astype(compute_dtype)  # (3,3,Cin,Cout)
    b2d = bias.astype(jnp.float32).reshape(1, Cout)

    kernel = functools.partial(
        _conv_relu_kernel, tile_h=tile_h, w_out=w_pad_dim,
        apply_relu=not init_zero)

    # VMEM budget: padded image (double-buffered at batch boundaries) + output tiles
    # + weights/bias + headroom.  Capped at 64 MiB so it is legal on v7x; v5e's
    # 16 MiB default is raised explicitly when needed.
    itemsize_in = jnp.dtype(compute_dtype).itemsize
    img_bytes = (h_pad_dim + 2) * (w_pad_dim + 2) * Cin * itemsize_in
    out_blk_bytes = tile_h * w_pad_dim * Cout * jnp.dtype(out_dtype).itemsize
    w_bytes = 9 * Cin * Cout * itemsize_in
    vmem_limit = int(min(64 * 1024 * 1024,
                         max(16 * 1024 * 1024,
                             4 * (img_bytes + out_blk_bytes) + w_bytes + (2 << 20))))

    out_nhwc = pl.pallas_call(
        kernel,
        out_shape=jax.ShapeDtypeStruct((N, h_pad_dim, w_pad_dim, Cout), out_dtype),
        grid_spec=pltpu.PrefetchScalarGridSpec(
            num_scalar_prefetch=0,
            grid=(N, n_row_tiles),
            in_specs=[
                # Whole padded image; index constant along the row-tile axis, so it
                # is DMA'd to VMEM once per batch image and reused by every tile.
                pl.BlockSpec((1, h_pad_dim + 2, w_pad_dim + 2, Cin),
                             lambda n, r: (n, 0, 0, 0)),
                pl.BlockSpec((3, 3, Cin, Cout), lambda n, r: (0, 0, 0, 0)),
                pl.BlockSpec((1, Cout), lambda n, r: (0, 0)),
            ],
            out_specs=pl.BlockSpec((1, tile_h, w_pad_dim, Cout),
                                   lambda n, r: (n, r, 0, 0)),
        ),
        compiler_params=pltpu.CompilerParams(
            dimension_semantics=("parallel", "parallel"),
            vmem_limit_bytes=vmem_limit),
    )(x_pad, w_hwio, b2d)

    out = out_nhwc[:, :H, :W, :]                 # drop padded rows/columns
    return jnp.transpose(out, (0, 3, 1, 2))      # back to NCHW (module semantics)


if __name__ == "__main__":
    # Small shapes consistent with the module: batch=2, Cin=4, Cout=8, spatial=16.
    N, Cin, H, W, Cout = 2, 4, 16, 16, 8
    key = jax.random.PRNGKey(0)
    kx, kw, kb = jax.random.split(key, 3)

    x = jax.random.normal(kx, (N, Cin, H, W), jnp.float32)
    w = jax.random.normal(kw, (Cout, Cin, 3, 3), jnp.float32) * 0.1
    b = jax.random.normal(kb, (Cout,), jnp.float32) * 0.1

    out = jax.block_until_ready(conv_relu(x, w, b, init_zero=False))

    # Reference: bf16-quantized operands, f32 accumulation (matches kernel math).
    xq = x.astype(jnp.bfloat16).astype(jnp.float32)
    wq = w.astype(jnp.bfloat16).astype(jnp.float32)
    ref = lax.conv_general_dilated(
        xq, wq, window_strides=(1, 1), padding=((1, 1), (1, 1)),
        dimension_numbers=("NCHW", "OIHW", "NCHW")) + b[None, :, None, None]
    ref = jnp.where(ref >= 0, ref, LEAKY_SLOPE * ref)
    assert out.shape == ref.shape, "shape mismatch vs reference"
    assert jnp.allclose(out, ref, atol=1e-3, rtol=1e-3), "mismatch vs reference"

    print("KERNEL_OK")
</pallas_src>

<mosaic_0001>
module attributes {stable_mosaic.version = 11 : i64} {
  func.func @_conv_relu_kernel(%arg0: i32, %arg1: i32, %arg2: memref<1x18x18x4xbf16, #tpu.memory_space<vmem>>, %arg3: memref<3x3x4x8xbf16, #tpu.memory_space<vmem>>, %arg4: memref<1x8xf32, #tpu.memory_space<vmem>>, %arg5: memref<1x16x16x8xf32, #tpu.memory_space<vmem>>) attributes {dimension_semantics = [#tpu.dimension_semantics<parallel>, #tpu.dimension_semantics<parallel>], iteration_bounds = array<i64: 2, 1>, scalar_prefetch = 0 : i64, scratch_operands = 0 : i64, tpu.core_type = #tpu.core_type<tc>, window_params = [{transform_indices = @transform_0, window_bounds = array<i64: 1, 18, 18, 4>}, {pipeline_mode = #tpu.pipeline_mode<synchronous>, transform_indices = @transform_1, window_bounds = array<i64: 3, 3, 4, 8>}, {pipeline_mode = #tpu.pipeline_mode<synchronous>, transform_indices = @transform_2, window_bounds = array<i64: 1, 8>}, {transform_indices = @transform_3, window_bounds = array<i64: 1, 16, 16, 8>}]} {
    %c16_i32 = arith.constant 16 : i32
    %0 = arith.muli %arg1, %c16_i32 : i32
    %cst = arith.constant 0.000000e+00 : f32
    %1 = vector.broadcast %cst : f32 to vector<256x8xf32>
    %c0 = arith.constant 0 : index
    %2 = arith.index_cast %0 : i32 to index
    %c0_0 = arith.constant 0 : index
    %c0_1 = arith.constant 0 : index
    %3 = vector.load %arg2[%c0, %2, %c0_0, %c0_1] : memref<1x18x18x4xbf16, #tpu.memory_space<vmem>>, vector<1x18x16x4xbf16>
    %4 = vector.shape_cast %3 : vector<1x18x16x4xbf16> to vector<18x16x4xbf16>
    %5 = vector.extract_strided_slice %4 {offsets = [0, 0, 0], sizes = [16, 16, 4], strides = [1, 1, 1]} : vector<18x16x4xbf16> to vector<16x16x4xbf16>
    %6 = vector.shape_cast %5 : vector<16x16x4xbf16> to vector<256x4xbf16>
    %c0_2 = arith.constant 0 : index
    %c0_3 = arith.constant 0 : index
    %c0_4 = arith.constant 0 : index
    %c0_5 = arith.constant 0 : index
    %7 = vector.load %arg3[%c0_2, %c0_3, %c0_4, %c0_5] : memref<3x3x4x8xbf16, #tpu.memory_space<vmem>>, vector<1x1x4x8xbf16>
    %8 = vector.shape_cast %7 : vector<1x1x4x8xbf16> to vector<4x8xbf16>
    %cst_6 = arith.constant dense<0.000000e+00> : vector<256x8xf32>
    %9 = tpu.matmul %6, %8, %cst_6 {dimension_numbers = #tpu.dot_dimension_numbers<[1], [0], [0], [1], [0, 0, 1, 1], [], []>} : vector<256x4xbf16>, vector<4x8xbf16>, vector<256x8xf32> -> vector<256x8xf32>
    %10 = arith.addf %1, %9 : vector<256x8xf32>
    %11 = vector.extract_strided_slice %4 {offsets = [1, 0, 0], sizes = [16, 16, 4], strides = [1, 1, 1]} : vector<18x16x4xbf16> to vector<16x16x4xbf16>
    %12 = vector.shape_cast %11 : vector<16x16x4xbf16> to vector<256x4xbf16>
    %c1 = arith.constant 1 : index
    %c0_7 = arith.constant 0 : index
    %c0_8 = arith.constant 0 : index
    %c0_9 = arith.constant 0 : index
    %13 = vector.load %arg3[%c1, %c0_7, %c0_8, %c0_9] : memref<3x3x4x8xbf16, #tpu.memory_space<vmem>>, vector<1x1x4x8xbf16>
    %14 = vector.shape_cast %13 : vector<1x1x4x8xbf16> to vector<4x8xbf16>
    %cst_10 = arith.constant dense<0.000000e+00> : vector<256x8xf32>
    %15 = tpu.matmul %12, %14, %cst_10 {dimension_numbers = #tpu.dot_dimension_numbers<[1], [0], [0], [1], [0, 0, 1, 1], [], []>} : vector<256x4xbf16>, vector<4x8xbf16>, vector<256x8xf32> -> vector<256x8xf32>
    %16 = arith.addf %10, %15 : vector<256x8xf32>
    %17 = vector.extract_strided_slice %4 {offsets = [2, 0, 0], sizes = [16, 16, 4], strides = [1, 1, 1]} : vector<18x16x4xbf16> to vector<16x16x4xbf16>
    %18 = vector.shape_cast %17 : vector<16x16x4xbf16> to vector<256x4xbf16>
    %c2 = arith.constant 2 : index
    %c0_11 = arith.constant 0 : index
    %c0_12 = arith.constant 0 : index
    %c0_13 = arith.constant 0 : index
    %19 = vector.load %arg3[%c2, %c0_11, %c0_12, %c0_13] : memref<3x3x4x8xbf16, #tpu.memory_space<vmem>>, vector<1x1x4x8xbf16>
    %20 = vector.shape_cast %19 : vector<1x1x4x8xbf16> to vector<4x8xbf16>
    %cst_14 = arith.constant dense<0.000000e+00> : vector<256x8xf32>
    %21 = tpu.matmul %18, %20, %cst_14 {dimension_numbers = #tpu.dot_dimension_numbers<[1], [0], [0], [1], [0, 0, 1, 1], [], []>} : vector<256x4xbf16>, vector<4x8xbf16>, vector<256x8xf32> -> vector<256x8xf32>
    %22 = arith.addf %16, %21 : vector<256x8xf32>
    %c0_15 = arith.constant 0 : index
    %23 = arith.index_cast %0 : i32 to index
    %c1_16 = arith.constant 1 : index
    %c0_17 = arith.constant 0 : index
    %24 = vector.load %arg2[%c0_15, %23, %c1_16, %c0_17] : memref<1x18x18x4xbf16, #tpu.memory_space<vmem>>, vector<1x18x16x4xbf16>
    %25 = vector.shape_cast %24 : vector<1x18x16x4xbf16> to vector<18x16x4xbf16>
    %26 = vector.extract_strided_slice %25 {offsets = [0, 0, 0], sizes = [16, 16, 4], strides = [1, 1, 1]} : vector<18x16x4xbf16> to vector<16x16x4xbf16>
    %27 = vector.shape_cast %26 : vector<16x16x4xbf16> to vector<256x4xbf16>
    %c0_18 = arith.constant 0 : index
    %c1_19 = arith.constant 1 : index
    %c0_20 = arith.constant 0 : index
    %c0_21 = arith.constant 0 : index
    %28 = vector.load %arg3[%c0_18, %c1_19, %c0_20, %c0_21] : memref<3x3x4x8xbf16, #tpu.memory_space<vmem>>, vector<1x1x4x8xbf16>
    %29 = vector.shape_cast %28 : vector<1x1x4x8xbf16> to vector<4x8xbf16>
    %cst_22 = arith.constant dense<0.000000e+00> : vector<256x8xf32>
    %30 = tpu.matmul %27, %29, %cst_22 {dimension_numbers = #tpu.dot_dimension_numbers<[1], [0], [0], [1], [0, 0, 1, 1], [], []>} : vector<256x4xbf16>, vector<4x8xbf16>, vector<256x8xf32> -> vector<256x8xf32>
    %31 = arith.addf %22, %30 : vector<256x8xf32>
    %32 = vector.extract_strided_slice %25 {offsets = [1, 0, 0], sizes = [16, 16, 4], strides = [1, 1, 1]} : vector<18x16x4xbf16> to vector<16x16x4xbf16>
    %33 = vector.shape_cast %32 : vector<16x16x4xbf16> to vector<256x4xbf16>
    %c1_23 = arith.constant 1 : index
    %c1_24 = arith.constant 1 : index
    %c0_25 = arith.constant 0 : index
    %c0_26 = arith.constant 0 : index
    %34 = vector.load %arg3[%c1_23, %c1_24, %c0_25, %c0_26] : memref<3x3x4x8xbf16, #tpu.memory_space<vmem>>, vector<1x1x4x8xbf16>
    %35 = vector.shape_cast %34 : vector<1x1x4x8xbf16> to vector<4x8xbf16>
    %cst_27 = arith.constant dense<0.000000e+00> : vector<256x8xf32>
    %36 = tpu.matmul %33, %35, %cst_27 {dimension_numbers = #tpu.dot_dimension_numbers<[1], [0], [0], [1], [0, 0, 1, 1], [], []>} : vector<256x4xbf16>, vector<4x8xbf16>, vector<256x8xf32> -> vector<256x8xf32>
    %37 = arith.addf %31, %36 : vector<256x8xf32>
    %38 = vector.extract_strided_slice %25 {offsets = [2, 0, 0], sizes = [16, 16, 4], strides = [1, 1, 1]} : vector<18x16x4xbf16> to vector<16x16x4xbf16>
    %39 = vector.shape_cast %38 : vector<16x16x4xbf16> to vector<256x4xbf16>
    %c2_28 = arith.constant 2 : index
    %c1_29 = arith.constant 1 : index
    %c0_30 = arith.constant 0 : index
    %c0_31 = arith.constant 0 : index
    %40 = vector.load %arg3[%c2_28, %c1_29, %c0_30, %c0_31] : memref<3x3x4x8xbf16, #tpu.memory_space<vmem>>, vector<1x1x4x8xbf16>
    %41 = vector.shape_cast %40 : vector<1x1x4x8xbf16> to vector<4x8xbf16>
    %cst_32 = arith.constant dense<0.000000e+00> : vector<256x8xf32>
    %42 = tpu.matmul %39, %41, %cst_32 {dimension_numbers = #tpu.dot_dimension_numbers<[1], [0], [0], [1], [0, 0, 1, 1], [], []>} : vector<256x4xbf16>, vector<4x8xbf16>, vector<256x8xf32> -> vector<256x8xf32>
    %43 = arith.addf %37, %42 : vector<256x8xf32>
    %c0_33 = arith.constant 0 : index
    %44 = arith.index_cast %0 : i32 to index
    %c2_34 = arith.constant 2 : index
    %c0_35 = arith.constant 0 : index
    %45 = vector.load %arg2[%c0_33, %44, %c2_34, %c0_35] : memref<1x18x18x4xbf16, #tpu.memory_space<vmem>>, vector<1x18x16x4xbf16>
    %46 = vector.shape_cast %45 : vector<1x18x16x4xbf16> to vector<18x16x4xbf16>
    %47 = vector.extract_strided_slice %46 {offsets = [0, 0, 0], sizes = [16, 16, 4], strides = [1, 1, 1]} : vector<18x16x4xbf16> to vector<16x16x4xbf16>
    %48 = vector.shape_cast %47 : vector<16x16x4xbf16> to vector<256x4xbf16>
    %c0_36 = arith.constant 0 : index
    %c2_37 = arith.constant 2 : index
    %c0_38 = arith.constant 0 : index
    %c0_39 = arith.constant 0 : index
    %49 = vector.load %arg3[%c0_36, %c2_37, %c0_38, %c0_39] : memref<3x3x4x8xbf16, #tpu.memory_space<vmem>>, vector<1x1x4x8xbf16>
    %50 = vector.shape_cast %49 : vector<1x1x4x8xbf16> to vector<4x8xbf16>
    %cst_40 = arith.constant dense<0.000000e+00> : vector<256x8xf32>
    %51 = tpu.matmul %48, %50, %cst_40 {dimension_numbers = #tpu.dot_dimension_numbers<[1], [0], [0], [1], [0, 0, 1, 1], [], []>} : vector<256x4xbf16>, vector<4x8xbf16>, vector<256x8xf32> -> vector<256x8xf32>
    %52 = arith.addf %43, %51 : vector<256x8xf32>
    %53 = vector.extract_strided_slice %46 {offsets = [1, 0, 0], sizes = [16, 16, 4], strides = [1, 1, 1]} : vector<18x16x4xbf16> to vector<16x16x4xbf16>
    %54 = vector.shape_cast %53 : vector<16x16x4xbf16> to vector<256x4xbf16>
    %c1_41 = arith.constant 1 : index
    %c2_42 = arith.constant 2 : index
    %c0_43 = arith.constant 0 : index
    %c0_44 = arith.constant 0 : index
    %55 = vector.load %arg3[%c1_41, %c2_42, %c0_43, %c0_44] : memref<3x3x4x8xbf16, #tpu.memory_space<vmem>>, vector<1x1x4x8xbf16>
    %56 = vector.shape_cast %55 : vector<1x1x4x8xbf16> to vector<4x8xbf16>
    %cst_45 = arith.constant dense<0.000000e+00> : vector<256x8xf32>
    %57 = tpu.matmul %54, %56, %cst_45 {dimension_numbers = #tpu.dot_dimension_numbers<[1], [0], [0], [1], [0, 0, 1, 1], [], []>} : vector<256x4xbf16>, vector<4x8xbf16>, vector<256x8xf32> -> vector<256x8xf32>
    %58 = arith.addf %52, %57 : vector<256x8xf32>
    %59 = vector.extract_strided_slice %46 {offsets = [2, 0, 0], sizes = [16, 16, 4], strides = [1, 1, 1]} : vector<18x16x4xbf16> to vector<16x16x4xbf16>
    %60 = vector.shape_cast %59 : vector<16x16x4xbf16> to vector<256x4xbf16>
    %c2_46 = arith.constant 2 : index
    %c2_47 = arith.constant 2 : index
    %c0_48 = arith.constant 0 : index
    %c0_49 = arith.constant 0 : index
    %61 = vector.load %arg3[%c2_46, %c2_47, %c0_48, %c0_49] : memref<3x3x4x8xbf16, #tpu.memory_space<vmem>>, vector<1x1x4x8xbf16>
    %62 = vector.shape_cast %61 : vector<1x1x4x8xbf16> to vector<4x8xbf16>
    %cst_50 = arith.constant dense<0.000000e+00> : vector<256x8xf32>
    %63 = tpu.matmul %60, %62, %cst_50 {dimension_numbers = #tpu.dot_dimension_numbers<[1], [0], [0], [1], [0, 0, 1, 1], [], []>} : vector<256x4xbf16>, vector<4x8xbf16>, vector<256x8xf32> -> vector<256x8xf32>
    %64 = arith.addf %58, %63 : vector<256x8xf32>
    %c0_51 = arith.constant 0 : index
    %c0_52 = arith.constant 0 : index
    %65 = vector.load %arg4[%c0_51, %c0_52] : memref<1x8xf32, #tpu.memory_space<vmem>>, vector<1x8xf32>
    %66 = vector.broadcast %65 : vector<1x8xf32> to vector<256x8xf32>
    %67 = arith.addf %64, %66 : vector<256x8xf32>
    %cst_53 = arith.constant 0.000000e+00 : f32
    %68 = vector.broadcast %cst_53 : f32 to vector<256x8xf32>
    %69 = arith.cmpf oge, %67, %68 : vector<256x8xf32>
    %cst_54 = arith.constant 0.00999999977 : f32
    %70 = vector.broadcast %cst_54 : f32 to vector<256x8xf32>
    %71 = arith.mulf %70, %67 : vector<256x8xf32>
    %72 = arith.select %69, %67, %71 : vector<256x8xi1>, vector<256x8xf32>
    %73 = vector.shape_cast %72 : vector<256x8xf32> to vector<16x16x8xf32>
    %c0_55 = arith.constant 0 : index
    %c0_56 = arith.constant 0 : index
    %c0_57 = arith.constant 0 : index
    %c0_58 = arith.constant 0 : index
    %74 = vector.load %arg5[%c0_55, %c0_56, %c0_57, %c0_58] : memref<1x16x16x8xf32, #tpu.memory_space<vmem>>, vector<1x16x16x8xf32>
    %75 = vector.shape_cast %74 : vector<1x16x16x8xf32> to vector<16x16x8xf32>
    %76 = vector.shape_cast %73 : vector<16x16x8xf32> to vector<1x16x16x8xf32>
    tpu.vector_store %arg5[%c0_55, %c0_56, %c0_57, %c0_58], %76 {strides = array<i32>} : memref<1x16x16x8xf32, #tpu.memory_space<vmem>>, vector<1x16x16x8xf32>,
    return
  }
  func.func @transform_0(%arg0: i32, %arg1: i32) -> (i32, i32, i32, i32) {
    %c0_i32 = arith.constant 0 : i32
    %c0_i32_0 = arith.constant 0 : i32
    %c0_i32_1 = arith.constant 0 : i32
    %c0_i32_2 = arith.constant 0 : i32
    return %arg0, %c0_i32, %c0_i32_0, %c0_i32_1 : i32, i32, i32, i32
  }
  func.func @transform_1(%arg0: i32, %arg1: i32) -> (i32, i32, i32, i32) {
    %c0_i32 = arith.constant 0 : i32
    %c0_i32_0 = arith.constant 0 : i32
    %c0_i32_1 = arith.constant 0 : i32
    %c0_i32_2 = arith.constant 0 : i32
    %c0_i32_3 = arith.constant 0 : i32
    return %c0_i32, %c0_i32_0, %c0_i32_1, %c0_i32_2 : i32, i32, i32, i32
  }
  func.func @transform_2(%arg0: i32, %arg1: i32) -> (i32, i32) {
    %c0_i32 = arith.constant 0 : i32
    %c0_i32_0 = arith.constant 0 : i32
    %c0_i32_1 = arith.constant 0 : i32
    return %c0_i32, %c0_i32_0 : i32, i32
  }
  func.func @transform_3(%arg0: i32, %arg1: i32) -> (i32, i32, i32, i32) {
    %c0_i32 = arith.constant 0 : i32
    %c0_i32_0 = arith.constant 0 : i32
    %c0_i32_1 = arith.constant 0 : i32
    return %arg0, %arg1, %c0_i32, %c0_i32_0 : i32, i32, i32, i32
  }
}

</mosaic_0001>

<bundles_post_ra>
// kernel: tpu_custom_call.1
= control target key start
LH: loop header
LB: loop body
LE: loop exit
PB: predicated region body
PF: predicated region fallthrough
CT: control target
= control target key end

     0   :  { %s4059_s12 = smov 0   ;;  %s4061_s13 = smov 0   ;;  %s5644_s0 = inlined_call_operand.vmem [shape: bf16[2,18,18,4], index: 0, kind: input, shape index: {}]   ;;  %s5645_s1 = inlined_call_operand.vmem [shape: bf16[3,3,4,8], index: 1, kind: input, shape index: {}]   ;;  %s5646_s2 = inlined_call_operand.vmem [shape: f32[1,8], index: 2, kind: input, shape index: {}]   ;;  %s5647_s3 = inlined_call_operand.vmem [shape: f32[2,16,16,8], index: 3, kind: output, shape index: {}]  }
   0x1   :  { %s4063_s14 = smov 0  }
   0x2 LB: > { %s25_s15 = sadd.s32 1, %s4033_s13  ;;  %p3267_p0 = scmp.ge.s32.totalorder %s4037_s14, 1  ;;  %s4037_s14 = sphi %s4063_s14, %s13_s14   ;;  %s4033_s13 = sphi %s4061_s13, %s5753_s13   ;;  %s4029_s12 = sphi %s4059_s12, %s5752_s12  }
   0x3   : > { %p27_p1 = scmp.ge.s32.totalorder %s25_s15, 2  ;;  %p151_p2 = scmp.lt.s32.totalorder %s4037_s14, 3 }
   0x5   : > { %s5755_s15 = smov (%p27_p1, %s25_s15), 0  ;;  %p152_p3 = pnand %p3267_p0, %p151_p2 }
   0x7   : > { %155 = sbr.rel (%p152_p3) target bundleno = 510 (0x1fe), region = 32 }
   0xc   : > { %v3271_v0 = vld [vmem:[%s5645_s1 + $0x6] sm:$0x3]  ;;  %vm369_vm0 = vcmask 1041408   ;;  %p180_p4 = scmp.lt.s32.totalorder %s4029_s12, 1  ;;  %v237_v2 = vld [vmem:[%s5645_s1] sm:$0x3] }
   0xd   : > { %3961 = vmatprep.subr.msk.bf16.mxu1 %vm369_vm0, %v3271_v0  ;;  %3960 = vmatprep.subr.msk.bf16.mxu0 %vm369_vm0, %v3271_v0  ;;  %v371_v1 = vsel %vm369_vm0, %v3271_v0, 0  ;;  %v3321_v3 = vld [vmem:[%s5645_s1 + $0xc] sm:$0x3]  ;;  %vm320_vm1 = vcmask 31744   ;;  %v3339_v8 = vld [vmem:[%s5645_s1 + $0x2] sm:$0x3] }
   0xe   : > { %3959 = vmatpush3.bf16.msra.mxu1 %v371_v1  ;;  %3653 = vmatpush3.bf16.msra.mxu0 %v371_v1  ;;  %s5757_s12 = smov (!%p180_p4, %s4029_s12), 1  ;;  %v717_v7 = vsel %vm369_vm0, %v3321_v3, 0  ;;  %v543_v10 = vsel %vm369_vm0, %v237_v2, 0  ;;  %v3372_v11 = vld [vmem:[%s5645_s1 + $0x8] sm:$0x3]  ;;  %v1452_v26 = vsel %vm369_vm0, %v3339_v8, 0 }
   0xf   : > { %3962 = vmatprep.subr.msk.bf16.mxu1 %vm369_vm0, %v237_v2  ;;  %3963 = vmatprep.subr.msk.bf16.mxu0 %vm369_vm0, %v3321_v3  ;;  %s3970_s22 = smul.u32 216, %s5757_s12  ;;  %v1680_v25 = vsel %vm369_vm0, %v3372_v11, 0  ;;  %v3390_v28 = vld [vmem:[%s5645_s1 + $0xe] sm:$0x3]  ;;  %v3424_v30 = vld [vmem:[%s5645_s1 + $0x4] sm:$0x3] }
  0x10   : > { %v4222_v47 = vsel %vm369_vm0, %v3390_v28, 0  ;;  %v4225_v48 = vsel %vm369_vm0, %v3424_v30, 0  ;;  %vm966_vm2 = vsmask.f32 3328  ;;  %vm967_vm3 = vsmask.f32 7440 }
  0x11   : > { %s4097_s25 = scalar_lea.vmem %s5644_s0, %s3970_s22  ;;  %vm4305_vm4 = vmor %vm966_vm2, %vm967_vm3  ;;  %vm2169_vm5 = vcmask 1042432   ;;  %vm2170_vm6 = vcmask 1046532   ;;  %s3498_s17 = sshll.u32 %s5757_s12, 8  ;;  %vm3141_vm8 = vcmask 64512  }
  0x12   : > { %v3995_v4 = vld [vmem:[%s4097_s25 + $0xc] sm:$0xff]   ;;  %v3997_v6 = vld [vmem:[%s4097_s25 + $0x18] sm:$0xff]   ;;  %v4120_v12 = vld [vmem:[%s4097_s25 + $0x24] sm:$0xff]   ;;  %s5462_s20 = scalar_lea.vmem %s5647_s3, %s3498_s17 }
  0x13   : > { %v4101_v5 = vld [vmem:[%s4097_s25 + $0x6c] sm:$0xff]   ;;  %3654 = vmatprep.mubr.msk.bf16.mxu0 %vm320_vm1, %v3995_v4  ;;  %v4112_v9 = vld [vmem:[%s4097_s25 + $0x78] sm:$0xff]   ;;  %v4125_v13 = vld [vmem:[%s4097_s25 + $0x84] sm:$0xff]  }
  0x14   : > { %3670 = vmatprep.mubr.msk.bf16.mxu1 %vm320_vm1, %v4101_v5  ;;  %3655 = vmatmul.mubr.msk.bf16.vlgmr.msra.gmra.mxu0 %vm320_vm1, %v3997_v6  ;;  %v4001_v14 = vld [vmem:[%s4097_s25 + $0x30] sm:$0xff]   ;;  %v4138_v16 = vld [vmem:[%s4097_s25 + $0x3c] sm:$0xff]   ;;  %v4151_v18 = vld [vmem:[%s4097_s25 + $0x48] sm:$0xff]  }
  0x15   : > { %3671 = vmatmul.mubr.msk.bf16.vlgmr.msra.gmra.mxu1 %vm320_vm1, %v4112_v9  ;;  %3721 = vmatpush3.bf16.msra.mxu0 %v717_v7  ;;  %v4134_v15 = vld [vmem:[%s4097_s25 + $0x90] sm:$0xff]   ;;  %v4141_v17 = vld [vmem:[%s4097_s25 + $0x9c] sm:$0xff]   ;;  %v4154_v19 = vld [vmem:[%s4097_s25 + $0xa8] sm:$0xff]  }
  0x16   : > { %3687 = vmatpush3.bf16.msra.mxu1 %v543_v10  ;;  %3658 = vmatprep.mubr.msk.bf16.mxu0 %vm320_vm1, %v4120_v12  ;;  %v4157_v20 = vld [vmem:[%s4097_s25 + $0x54] sm:$0xff]   ;;  %v4171_v22 = vld [vmem:[%s4097_s25 + $0x60] sm:$0xff]   ;;  %v914_v31 = vld [vmem:[%s4097_s25 + $0x8] sm:$0x1] }
  0x17   : > { %3674 = vmatprep.mubr.msk.bf16.mxu1 %vm320_vm1, %v4125_v13  ;;  %3964 = vmatprep.subr.msk.bf16.mxu1 %vm369_vm0, %v3339_v8  ;;  %v4160_v21 = vld [vmem:[%s4097_s25 + $0xb4] sm:$0xff]   ;;  %v4174_v23 = vld [vmem:[%s4097_s25 + $0xc0] sm:$0xff]   ;;  %v915_v34 = vld [vmem:[%s4097_s25 + $0xc] sm:$0xf]  ;;  %v989_v38 = vshll.u32 %v914_v31, 16 }
  0x18   : > { %3965 = vmatprep.subr.msk.bf16.mxu0 %vm369_vm0, %v3372_v11  ;;  %v4011_v24 = vld [vmem:[%s4097_s25] sm:$0xff]   ;;  %v4207_v37 = vld [vmem:[%s4097_s25 + $0x10] sm:$0xf]  ;;  %v994_v39 = vshrl.u32 %v915_v34, 16  ;;  %v4214_v44 = vld [vmem:[%s4097_s25 + $0x14] sm:$0x1] }
  0x19   : > { %v912_v27 = vld [vmem:[%s4097_s25] sm:$0xf]  ;;  %v4193_v29 = vld [vmem:[%s4097_s25 + $0x4] sm:$0xf]  ;;  %v997_v45 = vshll.u32 %v915_v34, 16  ;;  %v1003_v46 = vshll.u32 %v4207_v37, 16  ;;  %vm4500_vm7 = vmor %vm2169_vm5, %vm2170_vm6 }
  0x1a   : > { %v970_v32 = vshrl.u32 %v912_v27, 16  ;;  %v973_v33 = vshll.u32 %v912_v27, 16  ;;  %v979_v35 = vshll.u32 %v4193_v29, 16  ;;  %v983_v36 = vshrl.u32 %v4193_v29, 16  ;;  %v918_v51 = vld [vmem:[%s4097_s25 + $0x18] sm:$0xf] }
  0x1b   : > { %v4228_v49 = vrot.slane %v989_v38, 5  ;;  %v4230_v50 = vrot.slane %v994_v39, 4  ;;  %v4234_v52 = vld [vmem:[%s4097_s25 + $0x1c] sm:$0xf]  ;;  %v1007_v53 = vshrl.u32 %v4207_v37, 16  ;;  %v1013_v54 = vshll.u32 %v4214_v44, 16 }
  0x1c   : > { %3659 = vmatmul.mubr.msk.bf16.gmra.mxu0 %vm320_vm1, %v4001_v14  ;;  %v972_v40 = vrot.slane %v970_v32, 4  ;;  %v975_v41 = vrot.slane %v973_v33, 5  ;;  %v4211_v42 = vrot.slane %v979_v35, 5  ;;  %v985_v43 = vrot.slane %v983_v36, 4  ;;  %v921_v55 = vld [vmem:[%s4097_s25 + $0x24] sm:$0xf] }
  0x1d   : > { %3675 = vmatmul.mubr.msk.bf16.gmra.mxu1 %vm320_vm1, %v4134_v15  ;;  %3662 = vmatprep.mubr.msk.bf16.mxu0 %vm320_vm1, %v4138_v16  ;;  %v922_v56 = vld [vmem:[%s4097_s25 + $0x28] sm:$0xf]  ;;  %v4241_v59 = vrot.slane %v997_v45, 5  ;;  %v4243_v60 = vrot.slane %v1003_v46, 5  ;;  %v924_v61 = vld [vmem:[%s4097_s25 + $0x30] sm:$0xf] }
  0x1e   : > { %3678 = vmatprep.mubr.msk.bf16.mxu1 %vm320_vm1, %v4141_v17  ;;  %v976_v57 = vor.u32 %v975_v41, %v972_v40  ;;  %v986_v58 = vor.u32 %v985_v43, %v4211_v42  ;;  %v4247_v62 = vld [vmem:[%s4097_s25 + $0x34] sm:$0xf]  ;;  %v1018_v63 = vshrl.u32 %v918_v51, 16  ;;  %v1021_v0 = vshll.u32 %v918_v51, 16  ;;  %v927_v32 = vld [vmem:[%s4097_s25 + $0x3c] sm:$0xf] }
  0x1f   : > { %v1027_v1 = vshll.u32 %v4234_v52, 16  ;;  %v1031_v2 = vshrl.u32 %v4234_v52, 16  ;;  %v1042_v3 = vshrl.u32 %v921_v55, 16  ;;  %v1055_v7 = vshrl.u32 %v922_v56, 16  ;;  %v4269_v33 = vld [vmem:[%s4097_s25 + $0x20] sm:$0x1] }
  0x20   : > { %v1066_v8 = vshrl.u32 %v924_v61, 16  ;;  %v1069_v10 = vshll.u32 %v924_v61, 16  ;;  %v1075_v11 = vshll.u32 %v4247_v62, 16  ;;  %v1020_v27 = vrot.slane %v1018_v63, 4  ;;  %5653 = vst [vmem:[#allocation2_spill] sm:$0xff] %v4269_v33 }
  0x21   : > { %v1033_v31 = vrot.slane %v1031_v2, 4  ;;  %v1044_v34 = vrot.slane %v1042_v3, 4  ;;  %v4274_v38 = vld [vmem:[%s4097_s25 + $0x2c] sm:$0x1]  ;;  %v4278_v45 = vrot.slane %v986_v58, 4  ;;  %v4280_v46 = vrot.slane %v1013_v54, 5 }
  0x22   : > { %5654 = vst [vmem:[#allocation3_spill] sm:$0xff] %v4274_v38  ;;  %v1068_v39 = vrot.slane %v1066_v8, 4  ;;  %v1071_v40 = vrot.slane %v1069_v10, 5  ;;  %v4276_v41 = vrot.slane %v1075_v11, 5  ;;  %v1090_v51 = vshrl.u32 %v927_v32, 16 }
  0x23   : > { %v1037_v61 = vshll.u32 %v4269_v33, 16  ;;  %v4290_v63 = vld [vmem:[%s4097_s25 + $0x40] sm:$0xf]  ;;  %v4472_v33 = vld [vmem:[%s4097_s25 + $0x88] sm:$0xf] }
  0x24   : > { %3663 = vmatmul.mubr.msk.bf16.gmra.mxu0 %vm320_vm1, %v4151_v18  ;;  %v1072_v3 = vor.u32 %v1071_v40, %v1068_v39  ;;  %v1099_v8 = vshll.u32 %v4290_v63, 16  ;;  %v1103_v10 = vshrl.u32 %v4290_v63, 16  ;;  %v4322_v39 = vld [vmem:[%s4097_s25 + $0x44] sm:$0x1]  ;;  %v930_v40 = vld [vmem:[%s4097_s25 + $0x48] sm:$0xf] }
  0x25   : > { %3679 = vmatmul.mubr.msk.bf16.gmra.mxu1 %vm320_vm1, %v4154_v19  ;;  %3666 = vmatprep.mubr.msk.bf16.mxu0 %vm320_vm1, %v4157_v20 }
  0x26   : > { %3682 = vmatprep.mubr.msk.bf16.mxu1 %vm320_vm1, %v4160_v21 }
  0x2c   : > { %3667 = vmatmul.mubr.msk.bf16.gmra.mxu0 %vm320_vm1, %v4171_v22 }
  0x2d   : > { %3683 = vmatmul.mubr.msk.bf16.gmra.mxu1 %vm320_vm1, %v4174_v23  ;;  %3722 = vmatprep.mubr.msk.bf16.mxu0 %vm320_vm1, %v3997_v6 }
  0x2e   : > { %3688 = vmatprep.mubr.msk.bf16.mxu1 %vm320_vm1, %v4011_v24  ;;  %v1009_v24 = vrot.slane %v1007_v53, 4  ;;  %v1093_v53 = vshll.u32 %v927_v32, 16 }
  0x34   : > { %3723 = vmatmul.mubr.msk.bf16.vlgmr.msra.gmra.mxu0 %vm320_vm1, %v4120_v12 }
  0x35   : > { %3689 = vmatmul.mubr.msk.bf16.vlgmr.msra.gmra.mxu1 %vm320_vm1, %v3995_v4  ;;  %3789 = vmatpush3.bf16.msra.mxu0 %v1680_v25  ;;  %v1045_v4 = vshll.u32 %v921_v55, 16  ;;  %v5648_v25 = vrot.slane %v4207_v37, 5  ;;  %v1000_v55 = vor.u32 %v4241_v59, %v4230_v50 }
  0x36   : > { %3755 = vmatpush3.bf16.msra.mxu1 %v1452_v26  ;;  %3692 = vmatprep.mubr.msk.bf16.mxu1 %vm320_vm1, %v3997_v6  ;;  %v1051_v6 = vshll.u32 %v922_v56, 16  ;;  %v1010_v56 = vor.u32 %v1009_v24, %v4243_v60 }
  0x37   : > { %3726 = vmatprep.mubr.msk.bf16.mxu0 %vm320_vm1, %v4001_v14  ;;  %3966 = vmatprep.subr.msk.bf16.mxu1 %vm369_vm0, %v3390_v28  ;;  %v1023_v28 = vrot.slane %v1021_v0, 5  ;;  %v1047_v35 = vrot.slane %v1045_v4, 5  ;;  %v4297_v2 = vrot.slane %v5648_v25, 4  ;;  %v1001_v11 = vrot.slane %v1000_v55, 4 }
  0x38   : > { %3967 = vmatprep.subr.msk.bf16.mxu0 %vm369_vm0, %v3424_v30  ;;  %v4263_v30 = vrot.slane %v1027_v1, 5  ;;  %v4271_v36 = vrot.slane %v1051_v6, 5  ;;  %v1061_v1 = vshll.u32 %v4274_v38, 16  ;;  %v1092_v6 = vrot.slane %v1090_v51, 4 }
  0x39   : > { %v1048_v58 = vor.u32 %v1047_v35, %v1044_v34  ;;  %v1073_v35 = vrot.slane %v1072_v3, 4  ;;  %v1105_v55 = vrot.slane %v1103_v10, 4 }
  0x3a   : > { %v1034_v0 = vor.u32 %v1033_v31, %v4263_v30  ;;  %v1063_v34 = vrot.slane %v1061_v1, 5 }
  0x3b   : > { %v1049_v31 = vrot.slane %v1048_v58, 4 }
  0x3c   : > { %3727 = vmatmul.mubr.msk.bf16.gmra.mxu0 %vm320_vm1, %v4138_v16 }
  0x3d   : > { %3693 = vmatmul.mubr.msk.bf16.gmra.mxu1 %vm320_vm1, %v4120_v12  ;;  %3730 = vmatprep.mubr.msk.bf16.mxu0 %vm320_vm1, %v4151_v18  ;;  %v1079_v12 = vshrl.u32 %v4247_v62, 16 }
  0x3e   : > { %3696 = vmatprep.mubr.msk.bf16.mxu1 %vm320_vm1, %v4001_v14  ;;  %v4255_v14 = vrot.slane %v976_v57, 4  ;;  %v1024_v57 = vor.u32 %v1023_v28, %v1020_v27  ;;  %v1039_v27 = vrot.slane %v1037_v61, 5  ;;  %v1035_v28 = vrot.slane %v1034_v0, 4 }
  0x3f   : > { %v1081_v43 = vrot.slane %v1079_v12, 4  ;;  %v1011_v12 = vrot.slane %v1010_v56, 4  ;;  %v992_v56 = vsel %vm4305_vm4, %v4278_v45, %v4228_v49  ;;  %v1054_v49 = vsel %vm4305_vm4, %v1049_v31, %v4271_v36 }
  0x40   : > { %v1025_v24 = vrot.slane %v1024_v57, 4  ;;  %v1040_v61 = vsel %vm4305_vm4, %v1035_v28, %v1039_v27  ;;  %v1109_v45 = vshll.u32 %v4322_v39, 16  ;;  %v1117_v0 = vshll.u32 %v930_v40, 16 }
  0x41   : > { %v1082_v50 = vor.u32 %v1081_v43, %v4276_v41 }
  0x42   : > { %v1030_v57 = vsel %vm4305_vm4, %v1025_v24, %v4263_v30  ;;  %v1114_v30 = vshrl.u32 %v930_v40, 16  ;;  %v1111_v10 = vrot.slane %v1109_v45, 5  ;;  %v1119_v28 = vrot.slane %v1117_v0, 5 }
  0x43   : > { %v1083_v43 = vrot.slane %v1082_v50, 4  ;;  %v4370_v50 = vld [vmem:[%s4097_s25 + $0x50] sm:$0x1] }
  0x44   : > { %3731 = vmatmul.mubr.msk.bf16.gmra.mxu0 %vm320_vm1, %v4157_v20  ;;  %v1116_v27 = vrot.slane %v1114_v30, 4 }
  0x45   : > { %3697 = vmatmul.mubr.msk.bf16.gmra.mxu1 %vm320_vm1, %v4138_v16  ;;  %3734 = vmatprep.mubr.msk.bf16.mxu0 %vm320_vm1, %v4171_v22  ;;  %v1057_v16 = vrot.slane %v1055_v7, 4  ;;  %v1095_v7 = vrot.slane %v1093_v53, 5  ;;  %v4325_v53 = vrot.slane %v1099_v8, 5  ;;  %v4380_v8 = vcombine.low %v1030_v57, %v1040_v61 }
  0x46   : > { %3700 = vmatprep.mubr.msk.bf16.mxu1 %vm320_vm1, %v4151_v18  ;;  %v4283_v18 = vld [vmem:[%s4097_s25 + $0x38] sm:$0x1] }
  0x47   : > { %v1058_v54 = vor.u32 %v1057_v16, %v4271_v36  ;;  %v1085_v59 = vshll.u32 %v4283_v18, 16  ;;  %v1096_v51 = vor.u32 %v1095_v7, %v1092_v6  ;;  %v1106_v1 = vor.u32 %v1105_v55, %v4325_v53  ;;  %v4374_v6 = vld [vmem:[%s4097_s25 + $0x58] sm:$0xf] }
  0x48   : > { %v1151_v55 = vshrl.u32 %v4374_v6, 16 }
  0x49   : > { %v1059_v32 = vrot.slane %v1058_v54, 4  ;;  %v1087_v16 = vrot.slane %v1085_v59, 5  ;;  %v4359_v54 = vrot.slane %v1096_v51, 4  ;;  %v933_v59 = vld [vmem:[%s4097_s25 + $0x54] sm:$0xf]  ;;  %v1147_v51 = vshll.u32 %v4374_v6, 16 }
  0x4a   : > { %v1138_v40 = vshrl.u32 %v933_v59, 16 }
  0x4b   : > { %v1088_v36 = vsel %vm4305_vm4, %v1083_v43, %v1087_v16  ;;  %v4399_v16 = vld [vmem:[%s4097_s25 + $0x70] sm:$0xf]  ;;  %v1141_v43 = vshll.u32 %v933_v59, 16  ;;  %v4422_v59 = vld [vmem:[%s4097_s25 + $0x7c] sm:$0xf] }
  0x4c   : > { %3735 = vmatmul.mubr.msk.bf16.gmra.mxu0 %vm320_vm1, %v4101_v5 }
  0x4d   : > { %3701 = vmatmul.mubr.msk.bf16.gmra.mxu1 %vm320_vm1, %v4157_v20  ;;  %3738 = vmatprep.mubr.msk.bf16.mxu0 %vm320_vm1, %v4112_v9  ;;  %v982_v20 = vsel %vm4305_vm4, %v4255_v14, %v4211_v42  ;;  %v1006_v42 = vsel %vm4305_vm4, %v1001_v11, %v4243_v60  ;;  %v1016_v14 = vsel %vm4305_vm4, %v1011_v12, %v4280_v46  ;;  %v936_v11 = vld [vmem:[%s4097_s25 + $0x60] sm:$0xf]  ;;  %v4386_v12 = vld [vmem:[%s4097_s25 + $0x64] sm:$0xf] }
  0x4e   : > { %3704 = vmatprep.mubr.msk.bf16.mxu1 %vm320_vm1, %v4171_v22  ;;  %v4328_v22 = vld [vmem:[%s4097_s25 + $0x4c] sm:$0xf]  ;;  %v1064_v60 = vsel %vm4305_vm4, %v1059_v32, %v1063_v34  ;;  %v1078_v46 = vsel %vm4305_vm4, %v1073_v35, %v4276_v41  ;;  %v4367_v41 = vcombine.low %v982_v20, %v992_v56  ;;  %v4378_v7 = vcombine.low %v1006_v42, %v1016_v14 }
  0x4f   : > { %v1123_v58 = vshll.u32 %v4328_v22, 16  ;;  %v1127_v3 = vshrl.u32 %v4328_v22, 16  ;;  %v4388_v24 = vcombine.low %v1078_v46, %v1088_v36  ;;  %v939_v32 = vld [vmem:[%s4097_s25 + $0x6c] sm:$0xf]  ;;  %v1107_v34 = vrot.slane %v1106_v1, 4 }
  0x50   : > { %v1133_v35 = vshll.u32 %v4370_v50, 16  ;;  %v1162_v56 = vshrl.u32 %v936_v11, 16  ;;  %v1165_v42 = vshll.u32 %v936_v11, 16  ;;  %v1171_v14 = vshll.u32 %v4386_v12, 16 }
  0x51   : > { %v4390_v31 = vrot.slane %v1123_v58, 5  ;;  %v1129_v20 = vrot.slane %v1127_v3, 4  ;;  %v1175_v57 = vshrl.u32 %v4386_v12, 16  ;;  %v1189_v61 = vshll.u32 %v939_v32, 16  ;;  %v942_v58 = vld [vmem:[%s4097_s25 + $0x78] sm:$0xf] }
  0x52   : > { %v1112_v45 = vsel %vm4305_vm4, %v1107_v34, %v1111_v10  ;;  %v1120_v46 = vor.u32 %v1119_v28, %v1116_v27  ;;  %v4412_v0 = vrot.slane %v1133_v35, 5  ;;  %v1140_v36 = vrot.slane %v1138_v40, 4  ;;  %v4427_v10 = vld [vmem:[%s4097_s25 + $0x5c] sm:$0x1] }
  0x53   : > { %v1130_v30 = vor.u32 %v1129_v20, %v4390_v31  ;;  %v4419_v1 = vrot.slane %v1147_v51, 5  ;;  %v1153_v3 = vrot.slane %v1151_v55, 4  ;;  %v1164_v11 = vrot.slane %v1162_v56, 4 }
  0x54   : > { %3739 = vmatmul.mubr.msk.bf16.gmra.mxu0 %vm320_vm1, %v4125_v13  ;;  %v1167_v27 = vrot.slane %v1165_v42, 5  ;;  %v4429_v28 = vrot.slane %v1171_v14, 5  ;;  %v1191_v20 = vrot.slane %v1189_v61, 5  ;;  %v1210_v51 = vshrl.u32 %v942_v58, 16 }
  0x55   : > { %3705 = vmatmul.mubr.msk.bf16.gmra.mxu1 %vm320_vm1, %v4101_v5  ;;  %3742 = vmatprep.mubr.msk.bf16.mxu0 %vm320_vm1, %v4134_v15  ;;  %v4382_v5 = vcombine.low %v1054_v49, %v1064_v60  ;;  %v1195_v49 = vshll.u32 %v4399_v16, 16  ;;  %v1199_v60 = vshrl.u32 %v4399_v16, 16  ;;  %v1213_v55 = vshll.u32 %v942_v58, 16  ;;  %v945_v58 = vld [vmem:[%s4097_s25 + $0x84] sm:$0xf] }
  0x56   : > { %3708 = vmatprep.mubr.msk.bf16.mxu1 %vm320_vm1, %v4112_v9  ;;  %v1102_v9 = vsel %vm4305_vm4, %v4359_v54, %v4325_v53  ;;  %v1186_v53 = vshrl.u32 %v939_v32, 16  ;;  %v1143_v54 = vrot.slane %v1141_v43, 5  ;;  %v4432_v32 = vld [vmem:[%s4097_s25 + $0x68] sm:$0x1]  ;;  %v4437_v43 = vld [vmem:[%s4097_s25 + $0x74] sm:$0x1]  ;;  %v1154_v61 = vor.u32 %v1153_v3, %v4419_v1 }
  0x57   : > { %v4434_v35 = vrot.slane %v1195_v49, 5  ;;  %v1201_v40 = vrot.slane %v1199_v60, 4  ;;  %v1223_v56 = vshrl.u32 %v4422_v59, 16  ;;  %v4441_v42 = vcombine.low %v1102_v9, %v1112_v45 }
  0x58   : > { %v1188_v34 = vrot.slane %v1186_v53, 4  ;;  %v4443_v14 = vrot.slane %v1120_v46, 4  ;;  %v1144_v53 = vor.u32 %v1143_v54, %v1140_v36  ;;  %v1157_v49 = vshll.u32 %v4427_v10, 16 }
  0x59   : > { %v1168_v60 = vor.u32 %v1167_v27, %v1164_v11  ;;  %v1181_v25 = vshll.u32 %v4432_v32, 16  ;;  %v1202_v9 = vor.u32 %v1201_v40, %v4434_v35  ;;  %v1205_v45 = vshll.u32 %v4437_v43, 16  ;;  %v4467_v27 = vld [vmem:[%s4097_s25 + $0x80] sm:$0x1] }
  0x5a   : > { %v1192_v38 = vor.u32 %v1191_v20, %v1188_v34  ;;  %v1212_v46 = vrot.slane %v1210_v51, 4  ;;  %v1225_v54 = vrot.slane %v1223_v56, 4  ;;  %v1126_v3 = vsel %vm4305_vm4, %v4443_v14, %v4390_v31  ;;  %v4012_v31 = vld [vmem:[%s4097_s25 + $0xcc] sm:$0xff]  }
  0x5b   : > { %v1145_v11 = vrot.slane %v1144_v53, 4  ;;  %v1237_v34 = vshll.u32 %v945_v58, 16  ;;  %v1155_v20 = vrot.slane %v1154_v61, 4  ;;  %v1169_v40 = vrot.slane %v1168_v60, 4 }
  0x5c   : > { %3743 = vmatmul.mubr.msk.bf16.gmra.mxu0 %vm320_vm1, %v4141_v17  ;;  %v1183_v51 = vrot.slane %v1181_v25, 5  ;;  %v1207_v56 = vrot.slane %v1205_v45, 5  ;;  %v1229_v61 = vshll.u32 %v4467_v27, 16 }
  0x5d   : > { %3709 = vmatmul.mubr.msk.bf16.gmra.mxu1 %vm320_vm1, %v4125_v13  ;;  %3746 = vmatprep.mubr.msk.bf16.mxu0 %vm320_vm1, %v4154_v19  ;;  %v1177_v13 = vrot.slane %v1175_v57, 4  ;;  %v4445_v57 = vrot.slane %v1130_v30, 4  ;;  %v1215_v30 = vrot.slane %v1213_v55, 5  ;;  %v1193_v55 = vrot.slane %v1192_v38, 4 }
  0x5e   : > { %3712 = vmatprep.mubr.msk.bf16.mxu1 %vm320_vm1, %v4134_v15  ;;  %v1219_v15 = vshll.u32 %v4422_v59, 16  ;;  %v1150_v25 = vsel %vm4305_vm4, %v1145_v11, %v4419_v1  ;;  %v1239_v38 = vrot.slane %v1237_v34, 5 }
  0x5f   : > { %v1178_v26 = vor.u32 %v1177_v13, %v4429_v28  ;;  %v1234_v13 = vshrl.u32 %v945_v58, 16  ;;  %v1136_v14 = vsel %vm4305_vm4, %v4445_v57, %v4412_v0  ;;  %v1216_v53 = vor.u32 %v1215_v30, %v1212_v46  ;;  %v948_v57 = vld [vmem:[%s4097_s25 + $0x90] sm:$0xf] }
  0x60   : > { %v4456_v36 = vrot.slane %v1219_v15, 5  ;;  %v1203_v15 = vrot.slane %v1202_v9, 4  ;;  %v1243_v58 = vshll.u32 %v4472_v33, 16  ;;  %v1247_v0 = vshrl.u32 %v4472_v33, 16 }
  0x61   : > { %v1174_v9 = vsel %vm4305_vm4, %v1169_v40, %v4429_v28  ;;  %v1198_v45 = vsel %vm4305_vm4, %v1193_v55, %v4434_v35  ;;  %v4509_v28 = vrot.slane %v1229_v61, 5  ;;  %v4519_v35 = vld [vmem:[%s4097_s25 + $0x8c] sm:$0x1]  ;;  %v1261_v40 = vshll.u32 %v948_v57, 16 }
  0x62   : > { %v1208_v46 = vsel %vm4305_vm4, %v1203_v15, %v1207_v56  ;;  %v4530_v55 = vrot.slane %v1243_v58, 5  ;;  %v4532_v15 = vrot.slane %v1247_v0, 4  ;;  %v5660_v56 = vrot.slane %v4207_v37, 5  ;;  %v4569_v0 = vld [vmem:[%s4097_s25 + $0xa0] sm:$0xf] }
  0x63   : > { %v1253_v61 = vshll.u32 %v4519_v35, 16  ;;  %v4566_v58 = vrot.slane %v1261_v40, 5 }
  0x64   : > { %3747 = vmatmul.mubr.msk.bf16.gmra.mxu0 %vm320_vm1, %v4160_v21 }
  0x65   : > { %3713 = vmatmul.mubr.msk.bf16.gmra.mxu1 %vm320_vm1, %v4141_v17  ;;  %3750 = vmatprep.mubr.msk.bf16.mxu0 %vm320_vm1, %v4174_v23  ;;  %v1159_v17 = vrot.slane %v1157_v49, 5  ;;  %v1179_v23 = vrot.slane %v1178_v26, 4  ;;  %v1236_v26 = vrot.slane %v1234_v13, 4  ;;  %v2104_v49 = vld [vmem:[%s4097_s25 + $0xc] sm:$0xe] }
  0x66   : > { %3716 = vmatprep.mubr.msk.bf16.mxu1 %vm320_vm1, %v4154_v19  ;;  %v1226_v19 = vor.u32 %v1225_v54, %v4456_v36  ;;  %v4505_v54 = vrot.slane %v1216_v53, 4  ;;  %v4512_v13 = vld [vmem:[%s4097_s25 + $0x94] sm:$0xf]  ;;  %v3409_v34 = vrot.slane %v2104_v49, 9 }
  0x67   : > { %v1160_v60 = vsel %vm4305_vm4, %v1155_v20, %v1159_v17  ;;  %v1184_v1 = vsel %vm4305_vm4, %v1179_v23, %v1183_v51  ;;  %v1240_v20 = vor.u32 %v1239_v38, %v1236_v26  ;;  %v1258_v17 = vshrl.u32 %v948_v57, 16  ;;  %v2108_v26 = vld [vmem:[%s4097_s25 + $0x3c] sm:$0xe]  ;;  %v2110_v57 = vld [vmem:[%s4097_s25 + $0x54] sm:$0xe] }
  0x68   : > { %v4507_v11 = vrot.slane %v1226_v19, 4  ;;  %v5659_v51 = vrot.slane %v4214_v44, 5  ;;  %v2182_v44 = vsel %vm4500_vm7, %v3409_v34, %v5660_v56  ;;  %v1271_v53 = vshrl.u32 %v4512_v13, 16 }
  0x69   : > { %v1222_v37 = vsel %vm4305_vm4, %v4505_v54, %v4456_v36  ;;  %v4562_v49 = vrot.slane %v1240_v20, 4  ;;  %v3413_v40 = vrot.slane %v2108_v26, 9  ;;  %v2216_v26 = vrot.slane %v4328_v22, 5 }
  0x6a   : > { %v2185_v23 = vsel %vm4500_vm7, %v4297_v2, %v5659_v51  ;;  %v1267_v2 = vshll.u32 %v4512_v13, 16  ;;  %v1232_v38 = vsel %vm4305_vm4, %v4507_v11, %v4509_v28  ;;  %v4578_v51 = vrot.slane %v1271_v53, 4 }
  0x6b   : > { %v4542_v19 = vcombine.low %v2182_v44, %v2185_v23  ;;  %v2209_v44 = vrot.slane %v4290_v63, 5  ;;  %v2212_v53 = vrot.slane %v4322_v39, 5  ;;  %v2111_v39 = vld [vmem:[%s4097_s25 + $0x60] sm:$0xe]  ;;  %v2112_v63 = vld [vmem:[%s4097_s25 + $0x6c] sm:$0xe] }
  0x6c   : > { %3751 = vmatmul.mubr.msk.bf16.gmra.mxu0 %vm320_vm1, %v4012_v31  ;;  %v4538_v31 = vcombine.low %v1150_v25, %v1160_v60  ;;  %v4555_v25 = vld [vmem:[%s4097_s25 + $0x9c] sm:$0xf]  ;;  %v4564_v60 = vrot.slane %v1258_v17, 4  ;;  %v4576_v34 = vrot.slane %v1267_v2, 5  ;;  %v4584_v17 = vld [vmem:[%s5645_s1 + $0xa] sm:$0x3] }
  0x6d   : > { %3717 = vmatmul.mubr.msk.bf16.gmra.mxu1 %vm320_vm1, %v4160_v21  ;;  %3790 = vmatprep.mubr.msk.bf16.mxu0 %vm320_vm1, %v4378_v7  ;;  %v4528_v21 = vcombine.low %v1126_v3, %v1136_v14  ;;  %v4545_v3 = vcombine.low %v1174_v9, %v1184_v1  ;;  %v4547_v14 = vcombine.low %v1198_v45, %v1208_v46  ;;  %v2202_v1 = vrot.slane %v4247_v62, 5  ;;  %v2109_v46 = vld [vmem:[%s4097_s25 + $0x48] sm:$0xe] }
  0x6e   : > { %3756 = vmatprep.mubr.msk.bf16.mxu1 %vm320_vm1, %v4367_v41  ;;  %v2107_v41 = vld [vmem:[%s4097_s25 + $0x30] sm:$0xe]  ;;  %v2205_v45 = vrot.slane %v4283_v18, 5  ;;  %v1282_v20 = vshrl.u32 %v4555_v25, 16  ;;  %v1285_v62 = vshll.u32 %v4555_v25, 16  ;;  %v1246_v25 = vsel %vm4305_vm4, %v4562_v49, %v4530_v55 }
  0x6f   : > { %v3412_v9 = vrot.slane %v2107_v41, 9  ;;  %v4592_v18 = vld [vmem:[%s5645_s1 + $0x10] sm:$0x3]  ;;  %v2204_v56 = vrot.slane %v2202_v1, 4  ;;  %v3414_v41 = vrot.slane %v2109_v46, 9 }
  0x70   : > { %v1284_v11 = vrot.slane %v1282_v20, 4  ;;  %v1287_v36 = vrot.slane %v1285_v62, 5  ;;  %v5665_v62 = vor.u32 %v4532_v15, %v4530_v55 }
  0x71   : > { %v2203_v23 = vsel %vm4500_vm7, %v3412_v9, %v2202_v1  ;;  %v2211_v9 = vrot.slane %v2209_v44, 4  ;;  %v2217_v22 = vsel %vm4500_vm7, %v3414_v41, %v2216_v26  ;;  %v2218_v1 = vrot.slane %v2216_v26, 4 }
  0x72   : > { %v3416_v26 = vrot.slane %v2111_v39, 9  ;;  %v2237_v39 = vrot.slane %v4399_v16, 5 }
  0x73   : > { %v2213_v46 = vsel %vm4500_vm7, %v2211_v9, %v2212_v53  ;;  %v3417_v9 = vrot.slane %v2112_v63, 9 }
  0x74   : > { %3791 = vmatmul.mubr.msk.bf16.vlgmr.msra.gmra.mxu0 %vm320_vm1, %v4380_v8 }
  0x75   : > { %3757 = vmatmul.mubr.msk.bf16.vlgmr.msra.gmra.mxu1 %vm320_vm1, %v4378_v7  ;;  %3857 = vmatpush3.bf16.msra.mxu0 %v4225_v48  ;;  %v2206_v7 = vsel %vm4500_vm7, %v2204_v56, %v2205_v45  ;;  %v2210_v48 = vsel %vm4500_vm7, %v3413_v40, %v2209_v44  ;;  %v2219_v45 = vrot.slane %v4370_v50, 5  ;;  %v3415_v40 = vrot.slane %v2110_v57, 9 }
  0x76   : > { %3823 = vmatpush3.bf16.msra.mxu1 %v4222_v47  ;;  %3760 = vmatprep.mubr.msk.bf16.mxu1 %vm320_vm1, %v4380_v8  ;;  %v4617_v47 = vcombine.low %v2203_v23, %v2206_v7  ;;  %v2223_v56 = vrot.slane %v4374_v6, 5  ;;  %v2226_v44 = vrot.slane %v4427_v10, 5  ;;  %v4629_v23 = vcombine.low %v2210_v48, %v2213_v46  ;;  %v2113_v7 = vld [vmem:[%s4097_s25 + $0x78] sm:$0xe] }
  0x77   : > { %3794 = vmatprep.mubr.msk.bf16.mxu0 %vm320_vm1, %v4382_v5  ;;  %3968 = vmatprep.subr.msk.bf16.mxu1 %vm369_vm0, %v4584_v17  ;;  %v2220_v41 = vsel %vm4500_vm7, %v2218_v1, %v2219_v45  ;;  %v2230_v50 = vrot.slane %v4386_v12, 5  ;;  %v2233_v6 = vrot.slane %v4432_v32, 5  ;;  %v3418_v1 = vrot.slane %v2113_v7, 9  ;;  %v2114_v32 = vld [vmem:[%s4097_s25 + $0x84] sm:$0xe] }
  0x78   : > { %3969 = vmatprep.subr.msk.bf16.mxu0 %vm369_vm0, %v4592_v18  ;;  %v4635_v2 = vcombine.low %v2217_v22, %v2220_v41  ;;  %v2224_v57 = vsel %vm4500_vm7, %v3415_v40, %v2223_v56  ;;  %v2225_v53 = vrot.slane %v2223_v56, 4  ;;  %v2240_v22 = vrot.slane %v4437_v43, 5  ;;  %v2115_v40 = vld [vmem:[%s4097_s25 + $0x90] sm:$0xe] }
  0x79   : > { %v2231_v10 = vsel %vm4500_vm7, %v3416_v26, %v2230_v50  ;;  %v2232_v48 = vrot.slane %v2230_v50, 4  ;;  %v2244_v45 = vrot.slane %v4422_v59, 5  ;;  %v2238_v43 = vsel %vm4500_vm7, %v3417_v9, %v2237_v39 }
  0x7a   : > { %v2227_v12 = vsel %vm4500_vm7, %v2225_v53, %v2226_v44  ;;  %v2239_v46 = vrot.slane %v2237_v39, 4  ;;  %v2247_v41 = vrot.slane %v4467_v27, 5  ;;  %v3419_v50 = vrot.slane %v2114_v32, 9  ;;  %v2116_v53 = vld [vmem:[%s4097_s25 + $0x9c] sm:$0xe] }
  0x7b   : > { %v4654_v16 = vcombine.low %v2224_v57, %v2227_v12  ;;  %v2234_v63 = vsel %vm4500_vm7, %v2232_v48, %v2233_v6  ;;  %v2245_v56 = vsel %vm4500_vm7, %v3418_v1, %v2244_v45  ;;  %v2246_v44 = vrot.slane %v2244_v45, 4  ;;  %v4674_v6 = vld [vmem:[%s4097_s25 + $0x98] sm:$0x1]  ;;  %v2117_v39 = vld [vmem:[%s4097_s25 + $0xa8] sm:$0xe] }
  0x7c   : > { %3795 = vmatmul.mubr.msk.bf16.gmra.mxu0 %vm320_vm1, %v4388_v24  ;;  %v4663_v59 = vcombine.low %v2231_v10, %v2234_v63  ;;  %v2241_v26 = vsel %vm4500_vm7, %v2239_v46, %v2240_v22  ;;  %v2251_v7 = vrot.slane %v4472_v33, 5  ;;  %v2254_v57 = vrot.slane %v4519_v35, 5  ;;  %v4683_v12 = vld [vmem:[%s4097_s25 + $0xa4] sm:$0x1]  ;;  %v4691_v32 = vld [vmem:[%s4097_s25 + $0xac] sm:$0xf] }
  0x7d   : > { %3761 = vmatmul.mubr.msk.bf16.gmra.mxu1 %vm320_vm1, %v4382_v5  ;;  %3798 = vmatprep.mubr.msk.bf16.mxu0 %vm320_vm1, %v4441_v42  ;;  %v4676_v10 = vcombine.low %v2238_v43, %v2241_v26  ;;  %v2248_v48 = vsel %vm4500_vm7, %v2246_v44, %v2247_v41  ;;  %v3420_v9 = vrot.slane %v2115_v40, 9  ;;  %v2258_v27 = vrot.slane %v4512_v13, 5  ;;  %v4703_v26 = vld [vmem:[%s4097_s25 + $0xb0] sm:$0x1] }
  0x7e   : > { %3764 = vmatprep.mubr.msk.bf16.mxu1 %vm320_vm1, %v4388_v24  ;;  %v4685_v22 = vcombine.low %v2245_v56, %v2248_v48  ;;  %v2252_v33 = vsel %vm4500_vm7, %v3419_v50, %v2251_v7  ;;  %v2253_v1 = vrot.slane %v2251_v7, 4  ;;  %v2261_v45 = vrot.slane %v4674_v6, 5 }
  0x7f   : > { %v2259_v63 = vsel %vm4500_vm7, %v3420_v9, %v2258_v27  ;;  %v2260_v43 = vrot.slane %v2258_v27, 4  ;;  %v3421_v46 = vrot.slane %v2116_v53, 9  ;;  %v2265_v13 = vrot.slane %v4569_v0, 5 }
  0x80   : > { %v2255_v40 = vsel %vm4500_vm7, %v2253_v1, %v2254_v57  ;;  %v2268_v56 = vrot.slane %v4683_v12, 5  ;;  %v3422_v44 = vrot.slane %v2117_v39, 9  ;;  %v2272_v41 = vrot.slane %v4691_v32, 5 }
  0x81   : > { %v4705_v50 = vcombine.low %v2252_v33, %v2255_v40  ;;  %v2262_v7 = vsel %vm4500_vm7, %v2260_v43, %v2261_v45  ;;  %v2266_v53 = vsel %vm4500_vm7, %v3421_v46, %v2265_v13  ;;  %v2267_v57 = vrot.slane %v2265_v13, 4  ;;  %v2118_v43 = vld [vmem:[%s4097_s25 + $0xb4] sm:$0xe]  ;;  %v958_v13 = vld [vmem:[%s4097_s25 + $0xb8] sm:$0xf] }
  0x82   : > { %v4715_v48 = vcombine.low %v2259_v63, %v2262_v7  ;;  %v2273_v9 = vsel %vm4500_vm7, %v3422_v44, %v2272_v41  ;;  %v2274_v27 = vrot.slane %v2272_v41, 4  ;;  %v2275_v39 = vrot.slane %v4703_v26, 5  ;;  %v4770_v40 = vld [vmem:[%s4097_s25 + $0xbc] sm:$0x1]  ;;  %v957_v41 = vld [vmem:[%s4097_s25 + $0xb4] sm:$0xf] }
  0x83   : > { %v4732_v33 = vcombine.low %v1222_v37, %v1232_v38  ;;  %v1255_v1 = vrot.slane %v1253_v61, 5  ;;  %v1264_v45 = vor.u32 %v4566_v58, %v4564_v60  ;;  %v2269_v63 = vsel %vm4500_vm7, %v2267_v57, %v2268_v56  ;;  %v954_v58 = vld [vmem:[%s4097_s25 + $0xa8] sm:$0xf] }
  0x84   : > { %3799 = vmatmul.mubr.msk.bf16.gmra.mxu0 %vm320_vm1, %v4528_v21  ;;  %v4745_v54 = vcombine.low %v2266_v53, %v2269_v63  ;;  %v2276_v28 = vsel %vm4500_vm7, %v2274_v27, %v2275_v39  ;;  %v1277_v35 = vshll.u32 %v4674_v6, 16  ;;  %v5662_v37 = vshll.u32 %v4569_v0, 16 }
  0x85   : > { %3765 = vmatmul.mubr.msk.bf16.gmra.mxu1 %vm320_vm1, %v4441_v42  ;;  %3802 = vmatprep.mubr.msk.bf16.mxu0 %vm320_vm1, %v4538_v31  ;;  %v5663_v38 = vshrl.u32 %v4569_v0, 16  ;;  %v4757_v20 = vcombine.low %v2273_v9, %v2276_v28  ;;  %v1251_v46 = vrot.slane %v5665_v62, 4  ;;  %v1274_v6 = vor.u32 %v4578_v51, %v4576_v34 }
  0x86   : > { %3768 = vmatprep.mubr.msk.bf16.mxu1 %vm320_vm1, %v4528_v21  ;;  %5661 = vst [vmem:[#allocation4_spill] sm:$0xff] %v4745_v54  ;;  %v4752_v61 = vrot.slane %v5662_v37, 5  ;;  %v3423_v0 = vrot.slane %v2118_v43, 9  ;;  %v1265_v56 = vrot.slane %v1264_v45, 4  ;;  %v1301_v44 = vshll.u32 %v4683_v12, 16 }
  0x87   : > { %v1297_v60 = vrot.slane %v5663_v38, 4  ;;  %5664 = vst [vmem:[#allocation5_spill] sm:$0xff] %v4757_v20  ;;  %v2279_v7 = vrot.slane %v958_v13, 5  ;;  %v2282_v53 = vrot.slane %v4770_v40, 5  ;;  %v1288_v57 = vor.u32 %v1287_v36, %v1284_v11  ;;  %v4798_v54 = vld [vmem:[%s4097_s25 + $0xc4] sm:$0xf] }
  0x88   : > { %v1306_v49 = vshrl.u32 %v954_v58, 16  ;;  %v1309_v9 = vshll.u32 %v954_v58, 16  ;;  %v1315_v55 = vshll.u32 %v4691_v32, 16  ;;  %v1319_v51 = vshrl.u32 %v4691_v32, 16 }
  0x89   : > { %v1298_v15 = vor.u32 %v1297_v60, %v4752_v61  ;;  %v2280_v27 = vsel %vm4500_vm7, %v3423_v0, %v2279_v7  ;;  %v2281_v12 = vrot.slane %v2279_v7, 4  ;;  %v1256_v39 = vsel %vm4305_vm4, %v1251_v46, %v1255_v1  ;;  %v960_v0 = vld [vmem:[%s4097_s25 + $0xc0] sm:$0xf] }
  0x8a   : > { %v1275_v45 = vrot.slane %v1274_v6, 4  ;;  %v1279_v63 = vrot.slane %v1277_v35, 5  ;;  %v1330_v43 = vshrl.u32 %v957_v41, 16  ;;  %v1333_v32 = vshll.u32 %v957_v41, 16 }
  0x8b   : > { %v1339_v11 = vshll.u32 %v958_v13, 16  ;;  %v1343_v36 = vshrl.u32 %v958_v13, 16  ;;  %v2283_v28 = vsel %vm4500_vm7, %v2281_v12, %v2282_v53  ;;  %v1289_v37 = vrot.slane %v1288_v57, 4 }
  0x8c   : > { %3803 = vmatmul.mubr.msk.bf16.gmra.mxu0 %vm320_vm1, %v4545_v3  ;;  %v1303_v38 = vrot.slane %v1301_v44, 5  ;;  %v1308_v60 = vrot.slane %v1306_v49, 4  ;;  %v4792_v58 = vcombine.low %v2280_v27, %v2283_v28  ;;  %v1299_v1 = vrot.slane %v1298_v15, 4 }
  0x8d   : > { %3769 = vmatmul.mubr.msk.bf16.gmra.mxu1 %vm320_vm1, %v4538_v31  ;;  %3806 = vmatprep.mubr.msk.bf16.mxu0 %vm320_vm1, %v4547_v14  ;;  %v1311_v62 = vrot.slane %v1309_v9, 5  ;;  %v1317_v35 = vrot.slane %v1315_v55, 5  ;;  %v1321_v46 = vrot.slane %v1319_v51, 4  ;;  %v4794_v6 = vcombine.low %v1246_v25, %v1256_v39 }
  0x8e   : > { %3772 = vmatprep.mubr.msk.bf16.mxu1 %vm320_vm1, %v4545_v3  ;;  %v1332_v7 = vrot.slane %v1330_v43, 4  ;;  %v1335_v41 = vrot.slane %v1333_v32, 5  ;;  %v1341_v20 = vrot.slane %v1339_v11, 5  ;;  %v1345_v13 = vrot.slane %v1343_v36, 4 }
  0x8f   : > { %v1270_v44 = vsel %vm4305_vm4, %v1265_v56, %v4576_v34  ;;  %v1280_v53 = vsel %vm4305_vm4, %v1275_v45, %v1279_v63  ;;  %v1325_v57 = vshll.u32 %v4703_v26, 16  ;;  %v1294_v25 = vsel %vm4305_vm4, %v1289_v37, %v4752_v61 }
  0x90   : > { %v1304_v49 = vsel %vm4305_vm4, %v1299_v1, %v1303_v38  ;;  %v1312_v9 = vor.u32 %v1311_v62, %v1308_v60  ;;  %v1322_v55 = vor.u32 %v1321_v46, %v1317_v35  ;;  %v1648_v34 = vshrl.u32 %v960_v0, 16  ;;  %v962_v1 = vld [vmem:[%s4097_s25 + $0xc8] sm:$0x1] }
  0x91   : > { %v1651_v26 = vshll.u32 %v960_v0, 16  ;;  %v1657_v56 = vshll.u32 %v4798_v54, 16  ;;  %v1661_v15 = vshrl.u32 %v4798_v54, 16  ;;  %v1336_v61 = vor.u32 %v1335_v41, %v1332_v7 }
  0x92   : > { %v1346_v51 = vor.u32 %v1345_v13, %v1341_v20  ;;  %v1349_v27 = vshll.u32 %v4770_v40, 16  ;;  %v4822_v12 = vcombine.low %v1270_v44, %v1280_v53  ;;  %v4824_v39 = vcombine.low %v1294_v25, %v1304_v49  ;;  %v2103_v44 = vld [vmem:[%s4097_s25] sm:$0xe] }
  0x93   : > { %v1313_v45 = vrot.slane %v1312_v9, 4  ;;  %v1323_v63 = vrot.slane %v1322_v55, 4  ;;  %v1327_v43 = vrot.slane %v1325_v57, 5  ;;  %v1650_v32 = vrot.slane %v1648_v34, 4 }
  0x94   : > { %3807 = vmatmul.mubr.msk.bf16.gmra.mxu0 %vm320_vm1, %v4732_v33  ;;  %v1653_v11 = vrot.slane %v1651_v26, 5  ;;  %v1659_v36 = vrot.slane %v1657_v56, 5  ;;  %v1663_v28 = vrot.slane %v1661_v15, 4  ;;  %v1337_v37 = vrot.slane %v1336_v61, 4  ;;  %v4013_v26 = vld [vmem:[%s4097_s25 + $0x8] sm:$0x1] }
  0x95   : > { %3773 = vmatmul.mubr.msk.bf16.gmra.mxu1 %vm320_vm1, %v4547_v14  ;;  %3810 = vmatprep.mubr.msk.bf16.mxu0 %vm320_vm1, %v4794_v6  ;;  %v1347_v38 = vrot.slane %v1346_v51, 4  ;;  %v1351_v60 = vrot.slane %v1349_v27, 5  ;;  %v1318_v40 = vsel %vm4305_vm4, %v1313_v45, %v1317_v35  ;;  %v1328_v62 = vsel %vm4305_vm4, %v1323_v63, %v1327_v43  ;;  %v4861_v15 = vld [vmem:[%s4097_s25 + $0xd0] sm:$0xf]  ;;  %v4864_v61 = vld [vmem:[%s4097_s25 + $0xd4] sm:$0x1] }
  0x96   : > { %3776 = vmatprep.mubr.msk.bf16.mxu1 %vm320_vm1, %v4732_v33  ;;  %v1654_v46 = vor.u32 %v1653_v11, %v1650_v32  ;;  %v1664_v0 = vor.u32 %v1663_v28, %v1659_v36  ;;  %v1667_v7 = vshll.u32 %v962_v1, 16  ;;  %v1342_v41 = vsel %vm4305_vm4, %v1337_v37, %v1341_v20  ;;  %v2119_v43 = vld [vmem:[%s4097_s25 + $0xc0] sm:$0xe]  ;;  %v2120_v37 = vld [vmem:[%s4097_s25 + $0xcc] sm:$0xe] }
  0x97   : > { %v1352_v35 = vsel %vm4305_vm4, %v1347_v38, %v1351_v60  ;;  %v2174_v13 = vrot.slane %v4193_v29, 5  ;;  %v4845_v53 = vcombine.low %v1318_v40, %v1328_v62  ;;  %v3408_v55 = vrot.slane %v2103_v44, 9 }
  0x98   : > { %v4847_v57 = vcombine.low %v1342_v41, %v1352_v35  ;;  %v1655_v25 = vrot.slane %v1654_v46, 4  ;;  %v1665_v49 = vrot.slane %v1664_v0, 4  ;;  %v1669_v9 = vrot.slane %v1667_v7, 5  ;;  %v2105_v46 = vld [vmem:[%s4097_s25 + $0x18] sm:$0xe] }
  0x99   : > { %v2176_v34 = vrot.slane %v2174_v13, 4  ;;  %v2177_v20 = vrot.slane %v4013_v26, 5  ;;  %v2583_v51 = vrot.slane %v4798_v54, 5  ;;  %v2175_v27 = vsel %vm4500_vm7, %v3408_v55, %v2174_v13 }
  0x9a   : > { %v1660_v29 = vsel %vm4305_vm4, %v1655_v25, %v1659_v36  ;;  %v1670_v56 = vsel %vm4305_vm4, %v1665_v49, %v1669_v9  ;;  %v2800_v63 = vrot.slane %v4864_v61, 5  ;;  %v2797_v32 = vrot.slane %v4861_v15, 5  ;;  %v5666_v25 = vld [vmem:[#allocation2_spill] sm:$0xff]  ;;  %v4014_v9 = vld [vmem:[%s4097_s25 + $0x28] sm:$0xf] }
  0x9b   : > { %v2178_v45 = vsel %vm4500_vm7, %v2176_v34, %v2177_v20  ;;  %v3457_v11 = vrot.slane %v2119_v43, 9  ;;  %v2585_v36 = vrot.slane %v2583_v51, 4  ;;  %v2586_v28 = vrot.slane %v962_v1, 5  ;;  %v2106_v34 = vld [vmem:[%s4097_s25 + $0x24] sm:$0xe] }
  0x9c   : > { %3811 = vmatmul.mubr.msk.bf16.gmra.mxu0 %vm320_vm1, %v4822_v12  ;;  %v4877_v54 = vcombine.low %v1660_v29, %v1670_v56  ;;  %v2188_v38 = vrot.slane %v4234_v52, 5  ;;  %v3476_v60 = vrot.slane %v2120_v37, 9  ;;  %v2799_v40 = vrot.slane %v2797_v32, 4 }
  0x9d   : > { %3777 = vmatmul.mubr.msk.bf16.gmra.mxu1 %vm320_vm1, %v4794_v6  ;;  %3814 = vmatprep.mubr.msk.bf16.mxu0 %vm320_vm1, %v4824_v39  ;;  %v3425_v62 = vcombine.low %v2175_v27, %v2178_v45  ;;  %v2584_v0 = vsel %vm4500_vm7, %v3457_v11, %v2583_v51  ;;  %v2587_v7 = vsel %vm4500_vm7, %v2585_v36, %v2586_v28  ;;  %v3410_v13 = vrot.slane %v2105_v46, 9  ;;  %v5667_v51 = vld [vmem:[#allocation3_spill] sm:$0xff] }
  0x9e   : > { %3780 = vmatprep.mubr.msk.bf16.mxu1 %vm320_vm1, %v4822_v12  ;;  %v4885_v41 = vcombine.low %v2584_v0, %v2587_v7  ;;  %v4889_v1 = vsel %vm4500_vm7, %v3476_v60, %v2797_v32  ;;  %v4893_v52 = vsel %vm4500_vm7, %v2799_v40, %v2800_v63  ;;  %v2190_v44 = vrot.slane %v2188_v38, 4 }
  0x9f   : > { %v3478_v35 = vcombine.low %v4889_v1, %v4893_v52  ;;  %v2191_v49 = vrot.slane %v5666_v25, 5  ;;  %v2195_v55 = vrot.slane %v4014_v9, 5  ;;  %v2189_v26 = vsel %vm4500_vm7, %v3410_v13, %v2188_v38 }
  0xa0   : > { %v3411_v29 = vrot.slane %v2106_v34, 9  ;;  %v2198_v27 = vrot.slane %v5667_v51, 5  ;;  %v2811_v45 = vsel %vm369_vm0, %v4592_v18, 0  ;;  %v2597_v63 = vsel %vm369_vm0, %v4584_v17, 0 }
  0xa1   : > { %v2192_v20 = vsel %vm4500_vm7, %v2190_v44, %v2191_v49  ;;  %v2197_v56 = vrot.slane %v2195_v55, 4  ;;  %v1895_v0 = vshll.u32 %v4864_v61, 16  ;;  %v5669_v61 = vld [vmem:[#allocation5_spill] sm:$0xff] }
  0xa2   : > { %v4916_v43 = vcombine.low %v2189_v26, %v2192_v20 }
  0xa3   : > { %v2199_v32 = vsel %vm4500_vm7, %v2197_v56, %v2198_v27  ;;  %v1897_v9 = vrot.slane %v1895_v0, 5 }
  0xa4   : > { %3815 = vmatmul.mubr.msk.bf16.gmra.mxu0 %vm320_vm1, %v4845_v53 }
  0xa5   : > { %3781 = vmatmul.mubr.msk.bf16.gmra.mxu1 %vm320_vm1, %v4824_v39  ;;  %3818 = vmatprep.mubr.msk.bf16.mxu0 %vm320_vm1, %v4847_v57 }
  0xa6   : > { %3784 = vmatprep.mubr.msk.bf16.mxu1 %vm320_vm1, %v4845_v53 }
  0xac   : > { %3819 = vmatmul.mubr.msk.bf16.gmra.mxu0 %vm320_vm1, %v4877_v54 }
  0xad   : > { %3785 = vmatmul.mubr.msk.bf16.gmra.mxu1 %vm320_vm1, %v4847_v57  ;;  %3858 = vmatprep.mubr.msk.bf16.mxu0 %vm320_vm1, %v3425_v62 }
  0xae   : > { %3824 = vmatprep.mubr.msk.bf16.mxu1 %vm320_vm1, %v4380_v8  ;;  %v2196_v8 = vsel %vm4500_vm7, %v3411_v29, %v2195_v55 }
  0xaf   : > { %v4930_v17 = vcombine.low %v2196_v8, %v2199_v32 }
  0xb4   : > { %3859 = vmatmul.mubr.msk.bf16.vlgmr.msra.gmra.mxu0 %vm320_vm1, %v4542_v19 }
  0xb5   : > { %3825 = vmatmul.mubr.msk.bf16.vlgmr.msra.gmra.mxu1 %vm320_vm1, %v4382_v5  ;;  %3925 = vmatpush3.bf16.msra.mxu0 %v2811_v45  ;;  %v963_v5 = vld [vmem:[%s4097_s25 + $0xcc] sm:$0xf] }
  0xb6   : > { %3891 = vmatpush3.bf16.msra.mxu1 %v2597_v63  ;;  %3828 = vmatprep.mubr.msk.bf16.mxu1 %vm320_vm1, %v4388_v24 }
  0xb7   : > { %3862 = vmatprep.mubr.msk.bf16.mxu0 %vm320_vm1, %v4916_v43 }
  0xbc   : > { %3863 = vmatmul.mubr.msk.bf16.gmra.mxu0 %vm320_vm1, %v4930_v17 }
  0xbd   : > { %3829 = vmatmul.mubr.msk.bf16.gmra.mxu1 %vm320_vm1, %v4441_v42  ;;  %3866 = vmatprep.mubr.msk.bf16.mxu0 %vm320_vm1, %v4617_v47 }
  0xbe   : > { %3832 = vmatprep.mubr.msk.bf16.mxu1 %vm320_vm1, %v4528_v21  ;;  %v1876_v21 = vshrl.u32 %v963_v5, 16 }
  0xc0   : > { %v1878_v36 = vrot.slane %v1876_v21, 4 }
  0xc4   : > { %3867 = vmatmul.mubr.msk.bf16.gmra.mxu0 %vm320_vm1, %v4629_v23 }
  0xc5   : > { %3833 = vmatmul.mubr.msk.bf16.gmra.mxu1 %vm320_vm1, %v4538_v31  ;;  %3870 = vmatprep.mubr.msk.bf16.mxu0 %vm320_vm1, %v4635_v2  ;;  %v1879_v31 = vshll.u32 %v963_v5, 16 }
  0xc6   : > { %3836 = vmatprep.mubr.msk.bf16.mxu1 %vm320_vm1, %v4545_v3  ;;  %v1885_v3 = vshll.u32 %v4861_v15, 16 }
  0xc7   : > { %v1881_v28 = vrot.slane %v1879_v31, 5 }
  0xc8   : > { %v1887_v37 = vrot.slane %v1885_v3, 5 }
  0xc9   : > { %v1882_v62 = vor.u32 %v1881_v28, %v1878_v36 }
  0xcc   : > { %3871 = vmatmul.mubr.msk.bf16.gmra.mxu0 %vm320_vm1, %v4654_v16 }
  0xcd   : > { %3837 = vmatmul.mubr.msk.bf16.gmra.mxu1 %vm320_vm1, %v4547_v14  ;;  %3874 = vmatprep.mubr.msk.bf16.mxu0 %vm320_vm1, %v4663_v59  ;;  %v1889_v14 = vshrl.u32 %v4861_v15, 16 }
  0xce   : > { %3840 = vmatprep.mubr.msk.bf16.mxu1 %vm320_vm1, %v4732_v33 }
  0xcf   : > { %v1891_v38 = vrot.slane %v1889_v14, 4 }
  0xd1   : > { %v1892_v46 = vor.u32 %v1891_v38, %v1887_v37 }
  0xd3   : > { %v1893_v49 = vrot.slane %v1892_v46, 4 }
  0xd4   : > { %v4957_v24 = vpop.f32.mrf.mxu0  ;;  %3875 = vmatmul.mubr.msk.bf16.gmra.mxu0 %vm320_vm1, %v4676_v10 }
  0xd5   : > { %v4961_v42 = vpop.f32.mrf.mxu1  ;;  %3841 = vmatmul.mubr.msk.bf16.gmra.mxu1 %vm320_vm1, %v4794_v6  ;;  %3878 = vmatprep.mubr.msk.bf16.mxu0 %vm320_vm1, %v4685_v22  ;;  %v1898_v56 = vsel %vm4305_vm4, %v1893_v49, %v1897_v9 }
  0xd6   : > { %v4967_v30 = vpop.f32.mrf.mxu0  ;;  %3844 = vmatprep.mubr.msk.bf16.mxu1 %vm320_vm1, %v4822_v12 }
  0xd7   : > { %v4973_v18 = vpop.f32.mrf.mxu1 }
  0xd8   : > { %v4975_v33 = vpop.f32.mrf.mxu0 }
  0xd9   : > { %v4977_v11 = vpop.f32.mrf.mxu1 }
  0xda   : > { %v4979_v6 = vpop.f32.mrf.mxu0 }
  0xdb   : > { %v4981_v60 = vpop.f32.mrf.mxu1 }
  0xdc   : > { %v4983_v12 = vpop.f32.mrf.mxu0  ;;  %3879 = vmatmul.mubr.msk.bf16.gmra.mxu0 %vm320_vm1, %v4705_v50 }
  0xdd   : > { %v4987_v15 = vpop.f32.mrf.mxu1  ;;  %3845 = vmatmul.mubr.msk.bf16.gmra.mxu1 %vm320_vm1, %v4824_v39  ;;  %3882 = vmatprep.mubr.msk.bf16.mxu0 %vm320_vm1, %v4715_v48  ;;  %v1883_v39 = vrot.slane %v1882_v62, 4 }
  0xde   : > { %v4993_v40 = vpop.f32.mrf.mxu0  ;;  %3848 = vmatprep.mubr.msk.bf16.mxu1 %vm320_vm1, %v4845_v53  ;;  %v5668_v53 = vld [vmem:[#allocation4_spill] sm:$0xff] }
  0xdf   : > { %v4998_v7 = vpop.f32.mrf.mxu1  ;;  %v1888_v29 = vsel %vm4305_vm4, %v1883_v39, %v1887_v37 }
  0xe0   : > { %v5000_v13 = vpop.f32.mrf.mxu0 }
  0xe1   : > { %v5002_v44 = vpop.f32.mrf.mxu1 }
  0xe2   : > { %v5004_v25 = vpop.f32.mrf.mxu0 }
  0xe3   : > { %v5006_v55 = vpop.f32.mrf.mxu1 }
  0xe4   : > { %v5008_v34 = vpop.f32.mrf.mxu0  ;;  %3883 = vmatmul.mubr.msk.bf16.gmra.mxu0 %vm320_vm1, %v5668_v53 }
  0xe5   : > { %v5012_v26 = vpop.f32.mrf.mxu1  ;;  %3849 = vmatmul.mubr.msk.bf16.gmra.mxu1 %vm320_vm1, %v4847_v57  ;;  %3886 = vmatprep.mubr.msk.bf16.mxu0 %vm320_vm1, %v5669_v61  ;;  %v3391_v57 = vcombine.low %v1888_v29, %v1898_v56 }
  0xe6   : > { %v5018_v20 = vpop.f32.mrf.mxu0  ;;  %3852 = vmatprep.mubr.msk.bf16.mxu1 %vm320_vm1, %v4877_v54 }
  0xe7   : > { %v5026_v51 = vpop.f32.mrf.mxu1 }
  0xe8   : > { %v5028_v27 = vpop.f32.mrf.mxu0 }
  0xe9   : > { %v5030_v45 = vpop.f32.mrf.mxu1 }
  0xea   : > { %v5032_v63 = vpop.f32.mrf.mxu0 }
  0xeb   : > { %v5034_v8 = vpop.f32.mrf.mxu1 }
  0xec   : > { %v5036_v32 = vpop.f32.mrf.mxu0  ;;  %3887 = vmatmul.mubr.msk.bf16.gmra.mxu0 %vm320_vm1, %v4792_v58 }
  0xed   : > { %v5040_v54 = vpop.f32.mrf.mxu1  ;;  %3853 = vmatmul.mubr.msk.bf16.gmra.mxu1 %vm320_vm1, %v3391_v57  ;;  %3926 = vmatprep.mubr.msk.bf16.mxu0 %vm320_vm1, %v4916_v43 }
  0xee   : > { %v5045_v4 = vpop.f32.mrf.mxu0  ;;  %3892 = vmatprep.mubr.msk.bf16.mxu1 %vm320_vm1, %v4542_v19 }
  0xef   : > { %v5049_v5 = vpop.f32.mrf.mxu1 }
  0xf0   : > { %v5051_v21 = vpop.f32.mrf.mxu0 }
  0xf1   : > { %v5053_v31 = vpop.f32.mrf.mxu1 }
  0xf2   : > { %v5055_v3 = vpop.f32.mrf.mxu0 }
  0xf3   : > { %v5057_v14 = vpop.f32.mrf.mxu1 }
  0xf4   : > { %v3724_v36 = vpop.f32.mrf.mxu0  ;;  %3927 = vmatmul.mubr.msk.bf16.vlgmr.msra.gmra.mxu0 %vm320_vm1, %v4930_v17 }
  0xf5   : > { %v3690_v28 = vpop.f32.mrf.mxu1  ;;  %3893 = vmatmul.mubr.msk.bf16.vlgmr.msra.gmra.mxu1 %vm320_vm1, %v4916_v43  ;;  %3930 = vmatprep.mubr.msk.bf16.mxu0 %vm320_vm1, %v4617_v47 }
  0xf6   : > { %v588_v19 = vadd.f32 %v3690_v28, %v4957_v24  ;;  %v753_v37 = vpop.f32.mrf.mxu0  ;;  %3896 = vmatprep.mubr.msk.bf16.mxu1 %vm320_vm1, %v4930_v17 }
  0xf7   : > { %v579_v38 = vpop.f32.mrf.mxu1 }
  0xf8   : > { %v5068_v62 = vadd.f32 %v3724_v36, %v588_v19  ;;  %v580_v46 = vadd.f32 %v579_v38, %v4967_v30  ;;  %v3725_v0 = vpop.f32.mrf.mxu0 }
  0xf9   : > { %v3691_v39 = vpop.f32.mrf.mxu1 }
  0xfa   : > { %v5071_v49 = vadd.f32 %v753_v37, %v580_v46  ;;  %v591_v43 = vadd.f32 %v3691_v39, %v4975_v33  ;;  %v756_v9 = vpop.f32.mrf.mxu0 }
  0xfb   : > { %v582_v29 = vpop.f32.mrf.mxu1 }
  0xfc   : > { %v5074_v56 = vadd.f32 %v3725_v0, %v591_v43  ;;  %v583_v24 = vadd.f32 %v582_v29, %v4979_v6  ;;  %v3728_v57 = vpop.f32.mrf.mxu0  ;;  %3931 = vmatmul.mubr.msk.bf16.gmra.mxu0 %vm320_vm1, %v4629_v23 }
  0xfd   : > { %v3694_v17 = vpop.f32.mrf.mxu1  ;;  %3897 = vmatmul.mubr.msk.bf16.gmra.mxu1 %vm320_vm1, %v4617_v47  ;;  %3934 = vmatprep.mubr.msk.bf16.mxu0 %vm320_vm1, %v4635_v2 }
  0xfe   : > { %v5083_v30 = vadd.f32 %v756_v9, %v583_v24  ;;  %v604_v33 = vadd.f32 %v3694_v17, %v4983_v12  ;;  %v769_v36 = vpop.f32.mrf.mxu0  ;;  %3900 = vmatprep.mubr.msk.bf16.mxu1 %vm320_vm1, %v4629_v23 }
  0xff   : > { %v595_v6 = vpop.f32.mrf.mxu1 }
 0x100   : > { %v5088_v28 = vadd.f32 %v3728_v57, %v604_v33  ;;  %v596_v19 = vadd.f32 %v595_v6, %v4993_v40  ;;  %v3729_v37 = vpop.f32.mrf.mxu0 }
 0x101   : > { %v3695_v38 = vpop.f32.mrf.mxu1 }
 0x102   : > { %v5091_v46 = vadd.f32 %v769_v36, %v596_v19  ;;  %v607_v47 = vadd.f32 %v3695_v38, %v5000_v13  ;;  %v772_v0 = vpop.f32.mrf.mxu0 }
 0x103   : > { %v598_v39 = vpop.f32.mrf.mxu1 }
 0x104   : > { %v5094_v43 = vadd.f32 %v3729_v37, %v607_v47  ;;  %v599_v12 = vadd.f32 %v598_v39, %v5004_v25  ;;  %v3732_v9 = vpop.f32.mrf.mxu0  ;;  %3935 = vmatmul.mubr.msk.bf16.gmra.mxu0 %vm320_vm1, %v4654_v16 }
 0x105   : > { %v3698_v23 = vpop.f32.mrf.mxu1  ;;  %3901 = vmatmul.mubr.msk.bf16.gmra.mxu1 %vm320_vm1, %v4635_v2  ;;  %3938 = vmatprep.mubr.msk.bf16.mxu0 %vm320_vm1, %v4663_v59 }
 0x106   : > { %v5103_v40 = vadd.f32 %v772_v0, %v599_v12  ;;  %v620_v13 = vadd.f32 %v3698_v23, %v5008_v34  ;;  %v785_v29 = vpop.f32.mrf.mxu0  ;;  %3904 = vmatprep.mubr.msk.bf16.mxu1 %vm320_vm1, %v4654_v16 }
 0x107   : > { %v611_v25 = vpop.f32.mrf.mxu1 }
 0x108   : > { %v5108_v24 = vadd.f32 %v3732_v9, %v620_v13  ;;  %v612_v57 = vadd.f32 %v611_v25, %v5018_v20  ;;  %v3733_v17 = vpop.f32.mrf.mxu0 }
 0x109   : > { %v3699_v33 = vpop.f32.mrf.mxu1 }
 0x10a   : > { %v5111_v36 = vadd.f32 %v785_v29, %v612_v57  ;;  %v623_v2 = vadd.f32 %v3699_v33, %v5028_v27  ;;  %v788_v6 = vpop.f32.mrf.mxu0 }
 0x10b   : > { %v614_v19 = vpop.f32.mrf.mxu1 }
 0x10c   : > { %v5114_v37 = vadd.f32 %v3733_v17, %v623_v2  ;;  %v615_v34 = vadd.f32 %v614_v19, %v5032_v63  ;;  %v3736_v38 = vpop.f32.mrf.mxu0  ;;  %3939 = vmatmul.mubr.msk.bf16.gmra.mxu0 %vm320_vm1, %v4676_v10 }
 0x10d   : > { %v3702_v16 = vpop.f32.mrf.mxu1  ;;  %3905 = vmatmul.mubr.msk.bf16.gmra.mxu1 %vm320_vm1, %v4663_v59  ;;  %3942 = vmatprep.mubr.msk.bf16.mxu0 %vm320_vm1, %v4685_v22 }
 0x10e   : > { %v5123_v20 = vadd.f32 %v788_v6, %v615_v34  ;;  %v636_v27 = vadd.f32 %v3702_v16, %v5036_v32  ;;  %v801_v47 = vpop.f32.mrf.mxu0  ;;  %3908 = vmatprep.mubr.msk.bf16.mxu1 %vm320_vm1, %v4676_v10 }
 0x10f   : > { %v627_v63 = vpop.f32.mrf.mxu1 }
 0x110   : > { %v5128_v0 = vadd.f32 %v3736_v38, %v636_v27  ;;  %v628_v39 = vadd.f32 %v627_v63, %v5045_v4  ;;  %v3737_v12 = vpop.f32.mrf.mxu0 }
 0x111   : > { %v3703_v9 = vpop.f32.mrf.mxu1 }
 0x112   : > { %v5131_v23 = vadd.f32 %v801_v47, %v628_v39  ;;  %v639_v59 = vadd.f32 %v3703_v9, %v5051_v21  ;;  %v804_v13 = vpop.f32.mrf.mxu0 }
 0x113   : > { %v630_v29 = vpop.f32.mrf.mxu1 }
 0x114   : > { %v5134_v25 = vadd.f32 %v3737_v12, %v639_v59  ;;  %v631_v32 = vadd.f32 %v630_v29, %v5055_v3  ;;  %v3740_v57 = vpop.f32.mrf.mxu0  ;;  %3943 = vmatmul.mubr.msk.bf16.gmra.mxu0 %vm320_vm1, %v4705_v50 }
 0x115   : > { %v3706_v10 = vpop.f32.mrf.mxu1  ;;  %3909 = vmatmul.mubr.msk.bf16.gmra.mxu1 %vm320_vm1, %v4685_v22  ;;  %3946 = vmatprep.mubr.msk.bf16.mxu0 %vm320_vm1, %v4715_v48 }
 0x116   : > { %v5143_v4 = vadd.f32 %v804_v13, %v631_v32  ;;  %v652_v21 = vadd.f32 %v3706_v10, %v4961_v42  ;;  %v817_v17 = vpop.f32.mrf.mxu0  ;;  %3912 = vmatprep.mubr.msk.bf16.mxu1 %vm320_vm1, %v4705_v50 }
 0x117   : > { %v643_v3 = vpop.f32.mrf.mxu1 }
 0x118   : > { %v5148_v33 = vadd.f32 %v3740_v57, %v652_v21  ;;  %v644_v2 = vadd.f32 %v643_v3, %v4973_v18  ;;  %v3741_v6 = vpop.f32.mrf.mxu0 }
 0x119   : > { %v3707_v19 = vpop.f32.mrf.mxu1 }
 0x11a   : > { %v5151_v34 = vadd.f32 %v817_v17, %v644_v2  ;;  %v655_v22 = vadd.f32 %v3707_v19, %v4977_v11  ;;  %v820_v38 = vpop.f32.mrf.mxu0 }
 0x11b   : > { %v646_v16 = vpop.f32.mrf.mxu1 }
 0x11c   : > { %v5154_v27 = vadd.f32 %v3741_v6, %v655_v22  ;;  %v647_v42 = vadd.f32 %v646_v16, %v4981_v60  ;;  %v3744_v47 = vpop.f32.mrf.mxu0  ;;  %3947 = vmatmul.mubr.msk.bf16.gmra.mxu0 %vm320_vm1, %v5668_v53 }
 0x11d   : > { %v3710_v50 = vpop.f32.mrf.mxu1  ;;  %3913 = vmatmul.mubr.msk.bf16.gmra.mxu1 %vm320_vm1, %v4715_v48  ;;  %3950 = vmatprep.mubr.msk.bf16.mxu0 %vm320_vm1, %v5669_v61 }
 0x11e   : > { %v5163_v18 = vadd.f32 %v820_v38, %v647_v42  ;;  %v668_v11 = vadd.f32 %v3710_v50, %v4987_v15  ;;  %v833_v63 = vpop.f32.mrf.mxu0  ;;  %3916 = vmatprep.mubr.msk.bf16.mxu1 %vm320_vm1, %v5668_v53 }
 0x11f   : > { %v659_v60 = vpop.f32.mrf.mxu1 }
 0x120   : > { %v5168_v39 = vadd.f32 %v3744_v47, %v668_v11  ;;  %v660_v12 = vadd.f32 %v659_v60, %v4998_v7  ;;  %v3745_v9 = vpop.f32.mrf.mxu0 }
 0x121   : > { %v3711_v59 = vpop.f32.mrf.mxu1 }
 0x122   : > { %v5171_v13 = vadd.f32 %v833_v63, %v660_v12  ;;  %v671_v48 = vadd.f32 %v3711_v59, %v5002_v44  ;;  %v836_v29 = vpop.f32.mrf.mxu0 }
 0x123   : > { %v662_v32 = vpop.f32.mrf.mxu1 }
 0x124   : > { %v5174_v57 = vadd.f32 %v3745_v9, %v671_v48  ;;  %v663_v15 = vadd.f32 %v662_v32, %v5006_v55  ;;  %v3748_v10 = vpop.f32.mrf.mxu0  ;;  %3951 = vmatmul.mubr.msk.bf16.gmra.mxu0 %vm320_vm1, %v4792_v58 }
 0x125   : > { %v3714_v53 = vpop.f32.mrf.mxu1  ;;  %3917 = vmatmul.mubr.msk.bf16.gmra.mxu1 %vm320_vm1, %v5669_v61  ;;  %3954 = vmatprep.mubr.msk.bf16.mxu0 %vm320_vm1, %v4885_v41 }
 0x126   : > { %v5183_v7 = vadd.f32 %v836_v29, %v663_v15  ;;  %v684_v44 = vadd.f32 %v3714_v53, %v5012_v26  ;;  %v849_v21 = vpop.f32.mrf.mxu0  ;;  %3920 = vmatprep.mubr.msk.bf16.mxu1 %vm320_vm1, %v4792_v58 }
 0x127   : > { %v675_v55 = vpop.f32.mrf.mxu1 }
 0x128   : > { %v5188_v17 = vadd.f32 %v3748_v10, %v684_v44  ;;  %v676_v3 = vadd.f32 %v675_v55, %v5026_v51  ;;  %v3749_v2 = vpop.f32.mrf.mxu0 }
 0x129   : > { %v3715_v6 = vpop.f32.mrf.mxu1 }
 0x12a   : > { %v5191_v19 = vadd.f32 %v849_v21, %v676_v3  ;;  %v687_v61 = vadd.f32 %v3715_v6, %v5030_v45  ;;  %v852_v22 = vpop.f32.mrf.mxu0 }
 0x12b   : > { %v678_v38 = vpop.f32.mrf.mxu1 }
 0x12c   : > { %v5194_v16 = vadd.f32 %v3749_v2, %v687_v61  ;;  %v679_v26 = vadd.f32 %v678_v38, %v5034_v8  ;;  %v3752_v42 = vpop.f32.mrf.mxu0  ;;  %3955 = vmatmul.mubr.msk.bf16.gmra.mxu0 %vm320_vm1, %v3478_v35 }
 0x12d   : > { %v3718_v58 = vpop.f32.mrf.mxu1  ;;  %3921 = vmatmul.mubr.msk.bf16.gmra.mxu1 %vm320_vm1, %v4885_v41 }
 0x12e   : > { %v5203_v51 = vadd.f32 %v852_v22, %v679_v26  ;;  %v700_v45 = vadd.f32 %v3718_v58, %v5040_v54  ;;  %v865_v47 = vpop.f32.mrf.mxu0 }
 0x12f   : > { %v691_v50 = vpop.f32.mrf.mxu1 }
 0x130   : > { %v5206_v11 = vadd.f32 %v3752_v42, %v700_v45  ;;  %v692_v8 = vadd.f32 %v691_v50, %v5049_v5  ;;  %v3753_v63 = vpop.f32.mrf.mxu0 }
 0x131   : > { %v3719_v60 = vpop.f32.mrf.mxu1 }
 0x132   : > { %v5209_v12 = vadd.f32 %v865_v47, %v692_v8  ;;  %v703_v1 = vadd.f32 %v3719_v60, %v5053_v31  ;;  %v868_v52 = vpop.f32.mrf.mxu0 }
 0x133   : > { %v694_v35 = vpop.f32.mrf.mxu1 }
 0x134   : > { %v5212_v9 = vadd.f32 %v3753_v63, %v703_v1  ;;  %v695_v41 = vadd.f32 %v694_v35, %v5057_v14  ;;  %v3792_v59 = vpop.f32.mrf.mxu0 }
 0x135   : > { %v3758_v54 = vpop.f32.mrf.mxu1 }
 0x136   : > { %v5215_v48 = vadd.f32 %v868_v52, %v695_v41  ;;  %v1617_v29 = vadd.f32 %v3758_v54, %v5068_v62  ;;  %v1716_v32 = vpop.f32.mrf.mxu0 }
 0x137   : > { %v1488_v5 = vpop.f32.mrf.mxu1 }
 0x138   : > { %v5218_v15 = vadd.f32 %v3792_v59, %v1617_v29  ;;  %v1615_v10 = vadd.f32 %v1488_v5, %v5071_v49  ;;  %v3793_v53 = vpop.f32.mrf.mxu0 }
 0x139   : > { %v3759_v31 = vpop.f32.mrf.mxu1 }
 0x13a   : > { %v5221_v44 = vadd.f32 %v1716_v32, %v1615_v10  ;;  %v1618_v21 = vadd.f32 %v3759_v31, %v5074_v56  ;;  %v1719_v55 = vpop.f32.mrf.mxu0 }
 0x13b   : > { %v1491_v14 = vpop.f32.mrf.mxu1 }
 0x13c   : > { %v5224_v3 = vadd.f32 %v3793_v53, %v1618_v21  ;;  %v1616_v2 = vadd.f32 %v1491_v14, %v5083_v30  ;;  %v3796_v6 = vpop.f32.mrf.mxu0 }
 0x13d   : > { %v3762_v62 = vpop.f32.mrf.mxu1 }
 0x13e   : > { %v5227_v61 = vadd.f32 %v1719_v55, %v1616_v2  ;;  %v1621_v22 = vadd.f32 %v3762_v62, %v5088_v28  ;;  %v1732_v38 = vpop.f32.mrf.mxu0 }
 0x13f   : > { %v1504_v49 = vpop.f32.mrf.mxu1 }
 0x140   : > { %v5230_v26 = vadd.f32 %v3796_v6, %v1621_v22  ;;  %v1619_v42 = vadd.f32 %v1504_v49, %v5091_v46  ;;  %v3797_v58 = vpop.f32.mrf.mxu0 }
 0x141   : > { %v3763_v56 = vpop.f32.mrf.mxu1 }
 0x142   : > { %v5233_v45 = vadd.f32 %v1732_v38, %v1619_v42  ;;  %v1622_v47 = vadd.f32 %v3763_v56, %v5094_v43  ;;  %v1735_v50 = vpop.f32.mrf.mxu0 }
 0x143   : > { %v1507_v30 = vpop.f32.mrf.mxu1 }
 0x144   : > { %v5236_v8 = vadd.f32 %v3797_v58, %v1622_v47  ;;  %v1620_v63 = vadd.f32 %v1507_v30, %v5103_v40  ;;  %v3800_v60 = vpop.f32.mrf.mxu0 }
 0x145   : > { %v3766_v28 = vpop.f32.mrf.mxu1 }
 0x146   : > { %v5239_v1 = vadd.f32 %v1735_v50, %v1620_v63  ;;  %v1625_v52 = vadd.f32 %v3766_v28, %v5108_v24  ;;  %v1748_v35 = vpop.f32.mrf.mxu0 }
 0x147   : > { %v1520_v46 = vpop.f32.mrf.mxu1 }
 0x148   : > { %v5242_v41 = vadd.f32 %v3800_v60, %v1625_v52  ;;  %v1623_v59 = vadd.f32 %v1520_v46, %v5111_v36  ;;  %v3801_v54 = vpop.f32.mrf.mxu0 }
 0x149   : > { %v3767_v43 = vpop.f32.mrf.mxu1 }
 0x14a   : > { %v5245_v29 = vadd.f32 %v1748_v35, %v1623_v59  ;;  %v1626_v32 = vadd.f32 %v3767_v43, %v5114_v37  ;;  %v1751_v5 = vpop.f32.mrf.mxu0 }
 0x14b   : > { %v1523_v40 = vpop.f32.mrf.mxu1 }
 0x14c   : > { %v5248_v10 = vadd.f32 %v3801_v54, %v1626_v32  ;;  %v1624_v53 = vadd.f32 %v1523_v40, %v5123_v20  ;;  %v3804_v31 = vpop.f32.mrf.mxu0 }
 0x14d   : > { %v3770_v24 = vpop.f32.mrf.mxu1 }
 0x14e   : > { %v5251_v21 = vadd.f32 %v1751_v5, %v1624_v53  ;;  %v1629_v55 = vadd.f32 %v3770_v24, %v5128_v0  ;;  %v1764_v14 = vpop.f32.mrf.mxu0 }
 0x14f   : > { %v1536_v36 = vpop.f32.mrf.mxu1 }
 0x150   : > { %v5254_v2 = vadd.f32 %v3804_v31, %v1629_v55  ;;  %v1627_v6 = vadd.f32 %v1536_v36, %v5131_v23  ;;  %v3805_v62 = vpop.f32.mrf.mxu0 }
 0x151   : > { %v3771_v37 = vpop.f32.mrf.mxu1 }
 0x152   : > { %v5257_v22 = vadd.f32 %v1764_v14, %v1627_v6  ;;  %v1630_v38 = vadd.f32 %v3771_v37, %v5134_v25  ;;  %v1767_v49 = vpop.f32.mrf.mxu0 }
 0x153   : > { %v1539_v20 = vpop.f32.mrf.mxu1 }
 0x154   : > { %v5260_v42 = vadd.f32 %v3805_v62, %v1630_v38  ;;  %v1628_v58 = vadd.f32 %v1539_v20, %v5143_v4  ;;  %v3808_v56 = vpop.f32.mrf.mxu0 }
 0x155   : > { %v3774_v0 = vpop.f32.mrf.mxu1 }
 0x156   : > { %v5263_v47 = vadd.f32 %v1767_v49, %v1628_v58  ;;  %v1633_v50 = vadd.f32 %v3774_v0, %v5148_v33  ;;  %v1780_v30 = vpop.f32.mrf.mxu0 }
 0x157   : > { %v1552_v23 = vpop.f32.mrf.mxu1 }
 0x158   : > { %v5266_v63 = vadd.f32 %v3808_v56, %v1633_v50  ;;  %v1631_v60 = vadd.f32 %v1552_v23, %v5151_v34  ;;  %v3809_v28 = vpop.f32.mrf.mxu0 }
 0x159   : > { %v3775_v25 = vpop.f32.mrf.mxu1 }
 0x15a   : > { %v5269_v52 = vadd.f32 %v1780_v30, %v1631_v60  ;;  %v1634_v35 = vadd.f32 %v3775_v25, %v5154_v27  ;;  %v1783_v46 = vpop.f32.mrf.mxu0 }
 0x15b   : > { %v1555_v4 = vpop.f32.mrf.mxu1 }
 0x15c   : > { %v5272_v59 = vadd.f32 %v3809_v28, %v1634_v35  ;;  %v1632_v54 = vadd.f32 %v1555_v4, %v5163_v18  ;;  %v3812_v43 = vpop.f32.mrf.mxu0 }
 0x15d   : > { %v3778_v33 = vpop.f32.mrf.mxu1 }
 0x15e   : > { %5670 = vst [vmem:[#allocation2_spill] sm:$0xff] %v5272_v59  ;;  %v5275_v32 = vadd.f32 %v1783_v46, %v1632_v54  ;;  %v1637_v5 = vadd.f32 %v3778_v33, %v5168_v39  ;;  %v1796_v40 = vpop.f32.mrf.mxu0 }
 0x15f   : > { %v1568_v34 = vpop.f32.mrf.mxu1 }
 0x160   : > { %5671 = vst [vmem:[#allocation3_spill] sm:$0xff] %v5275_v32  ;;  %v5278_v53 = vadd.f32 %v3812_v43, %v1637_v5  ;;  %v1635_v31 = vadd.f32 %v1568_v34, %v5171_v13  ;;  %v3813_v24 = vpop.f32.mrf.mxu0 }
 0x161   : > { %v3779_v27 = vpop.f32.mrf.mxu1 }
 0x162   : > { %5672 = vst [vmem:[#allocation4_spill] sm:$0xff] %v5278_v53  ;;  %v5281_v55 = vadd.f32 %v1796_v40, %v1635_v31  ;;  %v1638_v14 = vadd.f32 %v3779_v27, %v5174_v57  ;;  %v1799_v36 = vpop.f32.mrf.mxu0 }
 0x163   : > { %v1571_v18 = vpop.f32.mrf.mxu1 }
 0x164   : > { %5673 = vst [vmem:[#allocation5_spill] sm:$0xff] %v5281_v55  ;;  %v5284_v6 = vadd.f32 %v3813_v24, %v1638_v14  ;;  %v1636_v62 = vadd.f32 %v1571_v18, %v5183_v7  ;;  %v3816_v37 = vpop.f32.mrf.mxu0 }
 0x165   : > { %v3782_v39 = vpop.f32.mrf.mxu1 }
 0x166   : > { %5674 = vst [vmem:[#allocation6_spill] sm:$0xff] %v5284_v6  ;;  %v5287_v38 = vadd.f32 %v1799_v36, %v1636_v62  ;;  %v1641_v49 = vadd.f32 %v3782_v39, %v5188_v17  ;;  %v1812_v20 = vpop.f32.mrf.mxu0 }
 0x167   : > { %v1584_v13 = vpop.f32.mrf.mxu1 }
 0x168   : > { %5675 = vst [vmem:[#allocation7_spill] sm:$0xff] %v5287_v38  ;;  %v5290_v58 = vadd.f32 %v3816_v37, %v1641_v49  ;;  %v1639_v56 = vadd.f32 %v1584_v13, %v5191_v19  ;;  %v3817_v0 = vpop.f32.mrf.mxu0 }
 0x169   : > { %v3783_v57 = vpop.f32.mrf.mxu1 }
 0x16a   : > { %5676 = vst [vmem:[#allocation8_spill] sm:$0xff] %v5290_v58  ;;  %v5293_v50 = vadd.f32 %v1812_v20, %v1639_v56  ;;  %v1642_v30 = vadd.f32 %v3783_v57, %v5194_v16  ;;  %v1815_v23 = vpop.f32.mrf.mxu0 }
 0x16b   : > { %v1587_v7 = vpop.f32.mrf.mxu1 }
 0x16c   : > { %5677 = vst [vmem:[#allocation9_spill] sm:$0xff] %v5293_v50  ;;  %v5296_v60 = vadd.f32 %v3817_v0, %v1642_v30  ;;  %v1640_v28 = vadd.f32 %v1587_v7, %v5203_v51  ;;  %v3820_v25 = vpop.f32.mrf.mxu0 }
 0x16d   : > { %v3786_v17 = vpop.f32.mrf.mxu1 }
 0x16e   : > { %5678 = vst [vmem:[#allocation10_spill] sm:$0xff] %v5296_v60  ;;  %v5299_v35 = vadd.f32 %v1815_v23, %v1640_v28  ;;  %v1645_v46 = vadd.f32 %v3786_v17, %v5206_v11  ;;  %v1828_v4 = vpop.f32.mrf.mxu0 }
 0x16f   : > { %v1600_v19 = vpop.f32.mrf.mxu1 }
 0x170   : > { %5679 = vst [vmem:[#allocation11_spill] sm:$0xff] %v5299_v35  ;;  %v5302_v54 = vadd.f32 %v3820_v25, %v1645_v46  ;;  %v1643_v43 = vadd.f32 %v1600_v19, %v5209_v12  ;;  %v3821_v33 = vpop.f32.mrf.mxu0 }
 0x171   : > { %v3787_v16 = vpop.f32.mrf.mxu1 }
 0x172   : > { %5680 = vst [vmem:[#allocation12_spill] sm:$0xff] %v5302_v54  ;;  %v5305_v5 = vadd.f32 %v1828_v4, %v1643_v43  ;;  %v1646_v40 = vadd.f32 %v3787_v16, %v5212_v9  ;;  %v1831_v34 = vpop.f32.mrf.mxu0 }
 0x173   : > { %v1603_v51 = vpop.f32.mrf.mxu1 }
 0x174   : > { %5681 = vst [vmem:[#allocation13_spill] sm:$0xff] %v5305_v5  ;;  %v5308_v31 = vadd.f32 %v3821_v33, %v1646_v40  ;;  %v1644_v24 = vadd.f32 %v1603_v51, %v5215_v48  ;;  %v5311_v27 = vpop.f32.mrf.mxu0 }
 0x175   : > { %v3826_v11 = vpop.f32.mrf.mxu1 }
 0x176   : > { %5682 = vst [vmem:[#allocation14_spill] sm:$0xff] %v5308_v31  ;;  %v5313_v14 = vadd.f32 %v1831_v34, %v1644_v24  ;;  %v5315_v36 = vpop.f32.mrf.mxu0 }
 0x177   : > { %v1944_v12 = vpop.f32.mrf.mxu1 }
 0x178   : > { %5683 = vst [vmem:[#allocation15_spill] sm:$0xff] %v5313_v14  ;;  %v5317_v18 = vpop.f32.mrf.mxu0 }
 0x179   : > { %v3827_v62 = vpop.f32.mrf.mxu1 }
 0x17a   : > { %v5319_v37 = vpop.f32.mrf.mxu0 }
 0x17b   : > { %v5321_v9 = vpop.f32.mrf.mxu1 }
 0x17c   : > { %v5323_v39 = vpop.f32.mrf.mxu0 }
 0x17d   : > { %v5325_v49 = vpop.f32.mrf.mxu1 }
 0x17e   : > { %v5327_v48 = vpop.f32.mrf.mxu0 }
 0x17f   : > { %v5329_v20 = vpop.f32.mrf.mxu1 }
 0x180   : > { %v5331_v13 = vpop.f32.mrf.mxu0 }
 0x181   : > { %v5333_v56 = vpop.f32.mrf.mxu1 }
 0x182   : > { %v5335_v0 = vpop.f32.mrf.mxu0 }
 0x183   : > { %v5337_v57 = vpop.f32.mrf.mxu1 }
 0x184   : > { %v5339_v30 = vpop.f32.mrf.mxu0 }
 0x185   : > { %v5341_v23 = vpop.f32.mrf.mxu1 }
 0x186   : > { %v5343_v7 = vpop.f32.mrf.mxu0 }
 0x187   : > { %v5345_v28 = vpop.f32.mrf.mxu1 }
 0x188   : > { %v5347_v25 = vpop.f32.mrf.mxu0 }
 0x189   : > { %v5349_v17 = vpop.f32.mrf.mxu1 }
 0x18a   : > { %v5351_v46 = vpop.f32.mrf.mxu0 }
 0x18b   : > { %v5353_v4 = vpop.f32.mrf.mxu1 }
 0x18c   : > { %v5355_v19 = vpop.f32.mrf.mxu0 }
 0x18d   : > { %v5357_v43 = vpop.f32.mrf.mxu1 }
 0x18e   : > { %v5359_v33 = vpop.f32.mrf.mxu0 }
 0x18f   : > { %v5361_v16 = vpop.f32.mrf.mxu1 }
 0x190   : > { %v5363_v40 = vpop.f32.mrf.mxu0 }
 0x191   : > { %v5365_v34 = vpop.f32.mrf.mxu1 }
 0x192   : > { %v5367_v51 = vpop.f32.mrf.mxu0 }
 0x193   : > { %v5369_v24 = vpop.f32.mrf.mxu1 }
 0x194   : > { %v5371_v14 = vpop.f32.mrf.mxu0 }
 0x195   : > { %v5373_v31 = vpop.f32.mrf.mxu1 }
 0x196   : > { %v5375_v5 = vpop.f32.mrf.mxu0 }
 0x197   : > { %5684 = vst [vmem:[#allocation16_spill] sm:$0xff] %v5375_v5  ;;  %v5377_v54 = vpop.f32.mrf.mxu1 }
 0x198   : > { %v5379_v35 = vpop.f32.mrf.mxu0 }
 0x199   : > { %5685 = vst [vmem:[#allocation17_spill] sm:$0xff] %v5379_v35  ;;  %v5381_v60 = vpop.f32.mrf.mxu1 }
 0x19a   : > { %5686 = vst [vmem:[#allocation18_spill] sm:$0xff] %v5381_v60  ;;  %v5383_v50 = vpop.f32.mrf.mxu0 }
 0x19b   : > { %5687 = vst [vmem:[#allocation19_spill] sm:$0xff] %v5383_v50  ;;  %v5385_v58 = vpop.f32.mrf.mxu1 }
 0x19c   : > { %5688 = vst [vmem:[#allocation20_spill] sm:$0xff] %v5385_v58  ;;  %v5387_v38 = vpop.f32.mrf.mxu0 }
 0x19d   : > { %5689 = vst [vmem:[#allocation21_spill] sm:$0xff] %v5387_v38  ;;  %v5389_v6 = vpop.f32.mrf.mxu1 }
 0x19e   : > { %5690 = vst [vmem:[#allocation22_spill] sm:$0xff] %v5389_v6  ;;  %v5391_v55 = vpop.f32.mrf.mxu0 }
 0x19f   : > { %5691 = vst [vmem:[#allocation23_spill] sm:$0xff] %v5391_v55  ;;  %v5393_v53 = vpop.f32.mrf.mxu1 }
 0x1a0   : > { %5692 = vst [vmem:[#allocation24_spill] sm:$0xff] %v5393_v53  ;;  %v5395_v32 = vpop.f32.mrf.mxu0 }
 0x1a1   : > { %5693 = vst [vmem:[#allocation25_spill] sm:$0xff] %v5395_v32  ;;  %v5397_v5 = vpop.f32.mrf.mxu1 }
 0x1a2   : > { %5694 = vst [vmem:[#allocation26_spill] sm:$0xff] %v5397_v5  ;;  %v5399_v59 = vpop.f32.mrf.mxu0 }
 0x1a3   : > { %5695 = vst [vmem:[#allocation27_spill] sm:$0xff] %v5399_v59  ;;  %v5401_v35 = vpop.f32.mrf.mxu1 }
 0x1a4   : > { %5696 = vst [vmem:[#allocation28_spill] sm:$0xff] %v5401_v35  ;;  %v5403_v60 = vpop.f32.mrf.mxu0 }
 0x1a5   : > { %5697 = vst [vmem:[#allocation29_spill] sm:$0xff] %v5403_v60  ;;  %v5405_v50 = vpop.f32.mrf.mxu1 }
 0x1a6   : > { %5698 = vst [vmem:[#allocation30_spill] sm:$0xff] %v5405_v50  ;;  %v5407_v58 = vpop.f32.mrf.mxu0 }
 0x1a7   : > { %5699 = vst [vmem:[#allocation31_spill] sm:$0xff] %v5407_v58  ;;  %v5409_v38 = vpop.f32.mrf.mxu1  ;;  %v2073_v58 = vadd.f32 %v3826_v11, %v5218_v15 }
 0x1a8   : > { %5700 = vst [vmem:[#allocation32_spill] sm:$0xff] %v5409_v38  ;;  %v5411_v6 = vpop.f32.mrf.mxu0 }
 0x1a9   : > { %5701 = vst [vmem:[#allocation33_spill] sm:$0xff] %v5411_v6  ;;  %v5413_v55 = vpop.f32.mrf.mxu1  ;;  %v2071_v6 = vadd.f32 %v1944_v12, %v5221_v44  ;;  %v2077_v44 = vadd.f32 %v5325_v49, %v5230_v26  ;;  %v2075_v12 = vadd.f32 %v5329_v20, %v5233_v45 }
 0x1aa   : > { %5702 = vst [vmem:[#allocation34_spill] sm:$0xff] %v5413_v55  ;;  %v5415_v53 = vpop.f32.mrf.mxu0 }
 0x1ab   : > { %5703 = vst [vmem:[#allocation35_spill] sm:$0xff] %v5415_v53  ;;  %v5417_v32 = vpop.f32.mrf.mxu1  ;;  %v2552_v20 = vadd.f32 %v5323_v39, %v2077_v44  ;;  %v2081_v39 = vadd.f32 %v5341_v23, %v5242_v41 }
 0x1ac   : > { %5704 = vst [vmem:[#allocation36_spill] sm:$0xff] %v5417_v32  ;;  %v5419_v5 = vpop.f32.mrf.mxu0 }
 0x1ad   : > { %5705 = vst [vmem:[#allocation37_spill] sm:$0xff] %v5419_v5  ;;  %v5421_v59 = vpop.f32.mrf.mxu1  ;;  %v2548_v5 = vadd.f32 %v5311_v27, %v2073_v58 }
 0x1ae   : > { %5706 = vst [vmem:[#allocation38_spill] sm:$0xff] %v5421_v59  ;;  %v5423_v35 = vpop.f32.mrf.mxu0  ;;  %v2074_v59 = vadd.f32 %v3827_v62, %v5224_v3  ;;  %v5449_v3 = vld [vmem:[%s5646_s2] ss:$0 sm:$0xff] }
 0x1af   : > { %5707 = vst [vmem:[#allocation39_spill] sm:$0xff] %v5423_v35  ;;  %v5425_v60 = vpop.f32.mrf.mxu1 }
 0x1b0   : > { %5708 = vst [vmem:[#allocation40_spill] sm:$0xff] %v5425_v60  ;;  %v5428_v50 = vpop.f32.mrf.mxu0  ;;  %v2546_v60 = vadd.f32 %v5315_v36, %v2071_v6  ;;  %v2549_v27 = vadd.f32 %v5317_v18, %v2074_v59 }
 0x1b1   : > { %5709 = vst [vmem:[#allocation41_spill] sm:$0xff] %v5428_v50  ;;  %v5430_v38 = vpop.f32.mrf.mxu1  ;;  %v2072_v50 = vadd.f32 %v5321_v9, %v5227_v61  ;;  %v2078_v61 = vadd.f32 %v5333_v56, %v5236_v8 }
 0x1b2   : > { %v5433_v55 = vpop.f32.mrf.mxu0 }
 0x1b3   : > { %5710 = vst [vmem:[#allocation42_spill] sm:$0xff] %v5433_v55  ;;  %v5435_v53 = vpop.f32.mrf.mxu1  ;;  %v2547_v49 = vadd.f32 %v5319_v37, %v2072_v50  ;;  %v2550_v55 = vadd.f32 %v5327_v48, %v2075_v12  ;;  %v2553_v50 = vadd.f32 %v5331_v13, %v2078_v61  ;;  %v2076_v37 = vadd.f32 %v5337_v57, %v5239_v1 }
 0x1b4   : > { %v3928_v35 = vpop.f32.mrf.mxu0  ;;  %v2082_v13 = vadd.f32 %v5349_v17, %v5248_v10  ;;  %v2080_v61 = vadd.f32 %v5353_v4, %v5251_v21  ;;  %v2556_v17 = vadd.f32 %v5339_v30, %v2081_v39  ;;  %v2085_v39 = vadd.f32 %v5357_v43, %v5254_v2 }
 0x1b5   : > { %v3894_v32 = vpop.f32.mrf.mxu1  ;;  %v2084_v2 = vadd.f32 %v5369_v24, %v5263_v47 }
 0x1b6   : > { %v2762_v15 = vadd.f32 %v3894_v32, %v2548_v5  ;;  %v2847_v11 = vpop.f32.mrf.mxu0 }
 0x1b7   : > { %v2633_v58 = vpop.f32.mrf.mxu1 }
 0x1b8   : > { %v2976_v6 = vadd.f32 %v3928_v35, %v2762_v15  ;;  %v2760_v32 = vadd.f32 %v2633_v58, %v2546_v60  ;;  %v3929_v5 = vpop.f32.mrf.mxu0  ;;  %v2079_v58 = vadd.f32 %v5345_v28, %v5245_v29 }
 0x1b9   : > { %v3895_v36 = vpop.f32.mrf.mxu1 }
 0x1ba   : > { %v3015_v26 = vadd.f32 %v5449_v3, %v2976_v6  ;;  %v2974_v62 = vadd.f32 %v2847_v11, %v2760_v32  ;;  %v2763_v45 = vadd.f32 %v3895_v36, %v2549_v27  ;;  %v2850_v9 = vpop.f32.mrf.mxu0 }
 0x1bb   : > { %v2636_v59 = vpop.f32.mrf.mxu1 }
 0x1bc   : > { %vm3047_vm9 = vcmp.ge.f32.partialorder %v3015_v26, 0.0  ;;  %v3079_v8 = vmul.f32 0.01, %v3015_v26  ;;  %v3013_v60 = vadd.f32 %v5449_v3, %v2974_v62  ;;  %v2977_v35 = vadd.f32 %v3929_v5, %v2763_v45  ;;  %v3932_v18 = vpop.f32.mrf.mxu0 }
 0x1bd   : > { %v2761_v48 = vadd.f32 %v2636_v59, %v2547_v49  ;;  %v3898_v56 = vpop.f32.mrf.mxu1  ;;  %v2551_v5 = vadd.f32 %v5335_v0, %v2076_v37 }
 0x1be   : > { %v3111_v15 = vsel %vm3047_vm9, %v3015_v26, %v3079_v8  ;;  %vm3045_vm10 = vcmp.ge.f32.partialorder %v3013_v60, 0.0  ;;  %v3077_v11 = vmul.f32 0.01, %v3013_v60  ;;  %v3016_v44 = vadd.f32 %v5449_v3, %v2977_v35  ;;  %v2863_v12 = vpop.f32.mrf.mxu0 }
 0x1bf   : > { %3144 = vst.msk [vmem:[%s5462_s20 + $0x10] sm:$0xff] %vm3141_vm8, %v3111_v15  ;;  %v2975_v1 = vadd.f32 %v2850_v9, %v2761_v48  ;;  %v2766_v57 = vadd.f32 %v3898_v56, %v2552_v20  ;;  %v2649_v41 = vpop.f32.mrf.mxu1  ;;  %v2557_v9 = vadd.f32 %v5347_v25, %v2082_v13  ;;  %v2555_v8 = vadd.f32 %v5351_v46, %v2080_v61 }
 0x1c0   : > { %v3109_v23 = vsel %vm3045_vm10, %v3013_v60, %v3077_v11  ;;  %vm3048_vm11 = vcmp.ge.f32.partialorder %v3016_v44, 0.0  ;;  %v3080_v27 = vmul.f32 0.01, %v3016_v44  ;;  %v2764_v6 = vadd.f32 %v2649_v41, %v2550_v55  ;;  %v3933_v32 = vpop.f32.mrf.mxu0 }
 0x1c1   : > { %3142 = vst.msk [vmem:[%s5462_s20] sm:$0xff] %vm3141_vm8, %v3109_v23  ;;  %v3014_v29 = vadd.f32 %v5449_v3, %v2975_v1  ;;  %v2980_v10 = vadd.f32 %v3932_v18, %v2766_v57  ;;  %v3899_v28 = vpop.f32.mrf.mxu1  ;;  %v2554_v55 = vadd.f32 %v5343_v7, %v2079_v58  ;;  %v2083_v46 = vadd.f32 %v5361_v16, %v5257_v22 }
 0x1c2   : > { %v3112_v36 = vsel %vm3048_vm11, %v3016_v44, %v3080_v27  ;;  %v2978_v26 = vadd.f32 %v2863_v12, %v2764_v6  ;;  %v2767_v62 = vadd.f32 %v3899_v28, %v2553_v50  ;;  %v2866_v45 = vpop.f32.mrf.mxu0  ;;  %v2086_v13 = vadd.f32 %v5365_v34, %v5260_v42 }
 0x1c3   : > { %3145 = vst.msk [vmem:[%s5462_s20 + $0x18] sm:$0xff] %vm3141_vm8, %v3112_v36  ;;  %vm3046_vm12 = vcmp.ge.f32.partialorder %v3014_v29, 0.0  ;;  %v3078_v0 = vmul.f32 0.01, %v3014_v29  ;;  %v3019_v21 = vadd.f32 %v5449_v3, %v2980_v10  ;;  %v2652_v4 = vpop.f32.mrf.mxu1  ;;  %v2560_v27 = vadd.f32 %v5355_v19, %v2085_v39  ;;  %v5715_v39 = vld [vmem:[#allocation4_spill] sm:$0xff] }
 0x1c4   : > { %v3017_v49 = vadd.f32 %v5449_v3, %v2978_v26  ;;  %v2981_v20 = vadd.f32 %v3933_v32, %v2767_v62  ;;  %v2765_v30 = vadd.f32 %v2652_v4, %v2551_v5  ;;  %v3936_v59 = vpop.f32.mrf.mxu0  ;;  %v2089_v6 = vadd.f32 %v5373_v31, %v5266_v63 }
 0x1c5   : > { %v3110_v60 = vsel %vm3046_vm12, %v3014_v29, %v3078_v0  ;;  %vm3051_vm13 = vcmp.ge.f32.partialorder %v3019_v21, 0.0  ;;  %v3083_v7 = vmul.f32 0.01, %v3019_v21  ;;  %v3902_v35 = vpop.f32.mrf.mxu1  ;;  %v2558_v24 = vadd.f32 %v5359_v33, %v2083_v46 }
 0x1c6   : > { %3143 = vst.msk [vmem:[%s5462_s20 + $0x8] sm:$0xff] %vm3141_vm8, %v3110_v60  ;;  %vm3049_vm14 = vcmp.ge.f32.partialorder %v3017_v49, 0.0  ;;  %v3081_v18 = vmul.f32 0.01, %v3017_v49  ;;  %v3020_v50 = vadd.f32 %v5449_v3, %v2981_v20  ;;  %v2979_v25 = vadd.f32 %v2866_v45, %v2765_v30  ;;  %v2879_v37 = vpop.f32.mrf.mxu0  ;;  %v5712_v20 = vld [vmem:[#allocation18_spill] sm:$0xff] }
 0x1c7   : > { %v3115_v48 = vsel %vm3051_vm13, %v3019_v21, %v3083_v7  ;;  %v2770_v56 = vadd.f32 %v3902_v35, %v2556_v17  ;;  %v2665_v15 = vpop.f32.mrf.mxu1  ;;  %v2561_v10 = vadd.f32 %v5363_v40, %v2086_v13  ;;  %v2559_v28 = vadd.f32 %v5367_v51, %v2084_v2 }
 0x1c8   : > { %3148 = vst.msk [vmem:[%s5462_s20 + $0x30] sm:$0xff] %vm3141_vm8, %v3115_v48  ;;  %v3113_v11 = vsel %vm3049_vm14, %v3017_v49, %v3081_v18  ;;  %vm3052_vm15 = vcmp.ge.f32.partialorder %v3020_v50, 0.0  ;;  %v3084_v44 = vmul.f32 0.01, %v3020_v50  ;;  %v3018_v12 = vadd.f32 %v5449_v3, %v2979_v25  ;;  %v3937_v58 = vpop.f32.mrf.mxu0  ;;  %v5711_v49 = vld [vmem:[#allocation2_spill] sm:$0xff]  ;;  %v5714_v25 = vld [vmem:[#allocation20_spill] sm:$0xff] }
 0x1c9   : > { %3146 = vst.msk [vmem:[%s5462_s20 + $0x20] sm:$0xff] %vm3141_vm8, %v3113_v11  ;;  %v2984_v22 = vadd.f32 %v3936_v59, %v2770_v56  ;;  %v2768_v43 = vadd.f32 %v2665_v15, %v2554_v55  ;;  %v3903_v16 = vpop.f32.mrf.mxu1  ;;  %v2564_v62 = vadd.f32 %v5371_v14, %v2089_v6  ;;  %v2090_v14 = vadd.f32 %v5712_v20, %v5711_v49  ;;  %v5719_v6 = vld [vmem:[#allocation19_spill] sm:$0xff] }
 0x1ca   : > { %v3116_v1 = vsel %vm3052_vm15, %v3020_v50, %v3084_v44  ;;  %vm3050_vm0 = vcmp.ge.f32.partialorder %v3018_v12, 0.0  ;;  %v3082_v57 = vmul.f32 0.01, %v3018_v12  ;;  %v2771_v41 = vadd.f32 %v3903_v16, %v2557_v9  ;;  %v2882_v23 = vpop.f32.mrf.mxu0  ;;  %v5713_v50 = vld [vmem:[#allocation3_spill] sm:$0xff]  ;;  %v5718_v16 = vld [vmem:[#allocation17_spill] sm:$0xff] }
 0x1cb   : > { %3149 = vst.msk [vmem:[%s5462_s20 + $0x38] sm:$0xff] %vm3141_vm8, %v3116_v1  ;;  %v3023_v42 = vadd.f32 %v5449_v3, %v2984_v22  ;;  %v2982_v47 = vadd.f32 %v2879_v37, %v2768_v43  ;;  %v2668_v34 = vpop.f32.mrf.mxu1  ;;  %v2087_v9 = vadd.f32 %v5377_v54, %v5269_v52  ;;  %v2088_v37 = vadd.f32 %v5714_v25, %v5713_v50  ;;  %v5716_v52 = vld [vmem:[#allocation22_spill] sm:$0xff] }
 0x1cc   : > { %v3114_v32 = vsel %vm3050_vm0, %v3018_v12, %v3082_v57  ;;  %v2985_v5 = vadd.f32 %v3937_v58, %v2771_v41  ;;  %v2769_v61 = vadd.f32 %v2668_v34, %v2555_v8  ;;  %v3940_v29 = vpop.f32.mrf.mxu0  ;;  %v2093_v54 = vadd.f32 %v5716_v52, %v5715_v39  ;;  %v5717_v58 = vld [vmem:[#allocation16_spill] sm:$0xff]  ;;  %v5729_v50 = vld [vmem:[#allocation30_spill] sm:$0xff] }
 0x1cd   : > { %3147 = vst.msk [vmem:[%s5462_s20 + $0x28] sm:$0xff] %vm3141_vm8, %v3114_v32  ;;  %vm3055_vm1 = vcmp.ge.f32.partialorder %v3023_v42, 0.0  ;;  %v3087_v19 = vmul.f32 0.01, %v3023_v42  ;;  %v3021_v63 = vadd.f32 %v5449_v3, %v2982_v47  ;;  %v3906_v31 = vpop.f32.mrf.mxu1  ;;  %v2562_v13 = vadd.f32 %v5717_v58, %v2087_v9  ;;  %v5720_v32 = vld [vmem:[#allocation21_spill] sm:$0xff] }
 0x1ce   : > { %v3024_v17 = vadd.f32 %v5449_v3, %v2985_v5  ;;  %v2983_v36 = vadd.f32 %v2882_v23, %v2769_v61  ;;  %v2774_v33 = vadd.f32 %v3906_v31, %v2560_v27  ;;  %v2895_v26 = vpop.f32.mrf.mxu0  ;;  %v2565_v1 = vadd.f32 %v5718_v16, %v2090_v14  ;;  %v5722_v31 = vld [vmem:[#allocation24_spill] sm:$0xff] }
 0x1cf   : > { %v3119_v45 = vsel %vm3055_vm1, %v3023_v42, %v3087_v19  ;;  %vm3053_vm2 = vcmp.ge.f32.partialorder %v3021_v63, 0.0  ;;  %v3085_v40 = vmul.f32 0.01, %v3021_v63  ;;  %v2681_v55 = vpop.f32.mrf.mxu1  ;;  %v2563_v42 = vadd.f32 %v5719_v6, %v2088_v37 }
 0x1d0   : > { %3152 = vst.msk [vmem:[%s5462_s20 + $0x50] sm:$0xff] %vm3141_vm8, %v3119_v45  ;;  %vm3056_vm3 = vcmp.ge.f32.partialorder %v3024_v17, 0.0  ;;  %v3088_v0 = vmul.f32 0.01, %v3024_v17  ;;  %v3022_v21 = vadd.f32 %v5449_v3, %v2983_v36  ;;  %v2988_v51 = vadd.f32 %v3940_v29, %v2774_v33  ;;  %v3941_v4 = vpop.f32.mrf.mxu0 }
 0x1d1   : > { %v3117_v30 = vsel %vm3053_vm2, %v3021_v63, %v3085_v40  ;;  %v2772_v59 = vadd.f32 %v2681_v55, %v2558_v24  ;;  %v3907_v8 = vpop.f32.mrf.mxu1  ;;  %v2568_v5 = vadd.f32 %v5720_v32, %v2093_v54  ;;  %v5721_v63 = vld [vmem:[#allocation5_spill] sm:$0xff]  ;;  %v5723_v55 = vld [vmem:[#allocation6_spill] sm:$0xff] }
 0x1d2   : > { %3150 = vst.msk [vmem:[%s5462_s20 + $0x40] sm:$0xff] %vm3141_vm8, %v3117_v30  ;;  %v3120_v60 = vsel %vm3056_vm3, %v3024_v17, %v3088_v0  ;;  %vm3054_vm4 = vcmp.ge.f32.partialorder %v3022_v21, 0.0  ;;  %v3086_v7 = vmul.f32 0.01, %v3022_v21  ;;  %v3027_v35 = vadd.f32 %v5449_v3, %v2988_v51  ;;  %v2898_v18 = vpop.f32.mrf.mxu0  ;;  %v5724_v0 = vld [vmem:[#allocation26_spill] sm:$0xff]  ;;  %v5725_v51 = vld [vmem:[#allocation7_spill] sm:$0xff] }
 0x1d3   : > { %3153 = vst.msk [vmem:[%s5462_s20 + $0x58] sm:$0xff] %vm3141_vm8, %v3120_v60  ;;  %v2986_v46 = vadd.f32 %v2895_v26, %v2772_v59  ;;  %v2775_v48 = vadd.f32 %v3907_v8, %v2561_v10  ;;  %v2684_v56 = vpop.f32.mrf.mxu1 }
 0x1d4   : > { %v3118_v15 = vsel %vm3054_vm4, %v3022_v21, %v3086_v7  ;;  %vm3059_vm5 = vcmp.ge.f32.partialorder %v3027_v35, 0.0  ;;  %v3091_v11 = vmul.f32 0.01, %v3027_v35  ;;  %v2773_v44 = vadd.f32 %v2684_v56, %v2559_v28  ;;  %v3944_v12 = vpop.f32.mrf.mxu0  ;;  %v5727_v7 = vld [vmem:[#allocation23_spill] sm:$0xff] }
 0x1d5   : > { %3151 = vst.msk [vmem:[%s5462_s20 + $0x48] sm:$0xff] %vm3141_vm8, %v3118_v15  ;;  %v3025_v2 = vadd.f32 %v5449_v3, %v2986_v46  ;;  %v2989_v22 = vadd.f32 %v3941_v4, %v2775_v48  ;;  %v3910_v43 = vpop.f32.mrf.mxu1  ;;  %v2091_v28 = vadd.f32 %v5722_v31, %v5721_v63  ;;  %v2094_v21 = vadd.f32 %v5724_v0, %v5723_v55  ;;  %v5726_v4 = vld [vmem:[#allocation28_spill] sm:$0xff]  ;;  %v5730_v15 = vld [vmem:[#allocation25_spill] sm:$0xff] }
 0x1d6   : > { %v3123_v57 = vsel %vm3059_vm5, %v3027_v35, %v3091_v11  ;;  %v2987_v41 = vadd.f32 %v2898_v18, %v2773_v44  ;;  %v2778_v23 = vadd.f32 %v3910_v43, %v2564_v62  ;;  %v2911_v27 = vpop.f32.mrf.mxu0  ;;  %v2092_v9 = vadd.f32 %v5726_v4, %v5725_v51  ;;  %v5728_v18 = vld [vmem:[#allocation8_spill] sm:$0xff] }
 0x1d7   : > { %3156 = vst.msk [vmem:[%s5462_s20 + $0x70] sm:$0xff] %vm3141_vm8, %v3123_v57  ;;  %vm3057_vm6 = vcmp.ge.f32.partialorder %v3025_v2, 0.0  ;;  %v3089_v47 = vmul.f32 0.01, %v3025_v2  ;;  %v3028_v34 = vadd.f32 %v5449_v3, %v2989_v22  ;;  %v2697_v24 = vpop.f32.mrf.mxu1  ;;  %v2566_v35 = vadd.f32 %v5727_v7, %v2091_v28  ;;  %v5732_v57 = vld [vmem:[#allocation9_spill] sm:$0xff]  ;;  %v5739_v55 = vld [vmem:[#allocation36_spill] sm:$0xff] }
 0x1d8   : > { %v3026_v61 = vadd.f32 %v5449_v3, %v2987_v41  ;;  %v2992_v29 = vadd.f32 %v3944_v12, %v2778_v23  ;;  %v2776_v10 = vadd.f32 %v2697_v24, %v2562_v13  ;;  %v3945_v19 = vpop.f32.mrf.mxu0  ;;  %v2097_v25 = vadd.f32 %v5729_v50, %v5728_v18  ;;  %v5731_v13 = vld [vmem:[#allocation27_spill] sm:$0xff]  ;;  %v5733_v41 = vld [vmem:[#allocation32_spill] sm:$0xff] }
 0x1d9   : > { %v3121_v17 = vsel %vm3057_vm6, %v3025_v2, %v3089_v47  ;;  %vm3060_vm7 = vcmp.ge.f32.partialorder %v3028_v34, 0.0  ;;  %v3092_v36 = vmul.f32 0.01, %v3028_v34  ;;  %v3911_v33 = vpop.f32.mrf.mxu1  ;;  %v2569_v11 = vadd.f32 %v5730_v15, %v2094_v21  ;;  %v5734_v47 = vld [vmem:[#allocation29_spill] sm:$0xff] }
 0x1da   : > { %3154 = vst.msk [vmem:[%s5462_s20 + $0x60] sm:$0xff] %vm3141_vm8, %v3121_v17  ;;  %vm3058_vm9 = vcmp.ge.f32.partialorder %v3026_v61, 0.0  ;;  %v3090_v26 = vmul.f32 0.01, %v3026_v61  ;;  %v3031_v62 = vadd.f32 %v5449_v3, %v2992_v29  ;;  %v2990_v45 = vadd.f32 %v2911_v27, %v2776_v10  ;;  %v2914_v40 = vpop.f32.mrf.mxu0  ;;  %v5735_v29 = vld [vmem:[#allocation10_spill] sm:$0xff] }
 0x1db   : > { %v3124_v49 = vsel %vm3060_vm7, %v3028_v34, %v3092_v36  ;;  %v2779_v20 = vadd.f32 %v3911_v33, %v2565_v1  ;;  %v2700_v14 = vpop.f32.mrf.mxu1  ;;  %v2567_v2 = vadd.f32 %v5731_v13, %v2092_v9  ;;  %v2095_v23 = vadd.f32 %v5733_v41, %v5732_v57  ;;  %v5736_v10 = vld [vmem:[#allocation34_spill] sm:$0xff] }
 0x1dc   : > { %3157 = vst.msk [vmem:[%s5462_s20 + $0x78] sm:$0xff] %vm3141_vm8, %v3124_v49  ;;  %v3122_v30 = vsel %vm3058_vm9, %v3026_v61, %v3090_v26  ;;  %vm3063_vm10 = vcmp.ge.f32.partialorder %v3031_v62, 0.0  ;;  %v3095_v59 = vmul.f32 0.01, %v3031_v62  ;;  %v3029_v8 = vadd.f32 %v5449_v3, %v2990_v45  ;;  %v3948_v60 = vpop.f32.mrf.mxu0 }
 0x1dd   : > { %3155 = vst.msk [vmem:[%s5462_s20 + $0x68] sm:$0xff] %vm3141_vm8, %v3122_v30  ;;  %v2993_v37 = vadd.f32 %v3945_v19, %v2779_v20  ;;  %v2777_v39 = vadd.f32 %v2700_v14, %v2563_v42  ;;  %v3914_v52 = vpop.f32.mrf.mxu1  ;;  %v2572_v34 = vadd.f32 %v5734_v47, %v2097_v25  ;;  %v2098_v19 = vadd.f32 %v5736_v10, %v5735_v29  ;;  %v5740_v30 = vld [vmem:[#allocation33_spill] sm:$0xff] }
 0x1de   : > { %v3127_v54 = vsel %vm3063_vm10, %v3031_v62, %v3095_v59  ;;  %vm3061_vm11 = vcmp.ge.f32.partialorder %v3029_v8, 0.0  ;;  %v3093_v46 = vmul.f32 0.01, %v3029_v8  ;;  %v2782_v48 = vadd.f32 %v3914_v52, %v2568_v5  ;;  %v2927_v56 = vpop.f32.mrf.mxu0  ;;  %v5737_v62 = vld [vmem:[#allocation31_spill] sm:$0xff] }
 0x1df   : > { %3160 = vst.msk [vmem:[%s5462_s20 + $0x90] sm:$0xff] %vm3141_vm8, %v3127_v54  ;;  %v3032_v44 = vadd.f32 %v5449_v3, %v2993_v37  ;;  %v2991_v12 = vadd.f32 %v2914_v40, %v2777_v39  ;;  %v2713_v58 = vpop.f32.mrf.mxu1  ;;  %v2570_v45 = vadd.f32 %v5737_v62, %v2095_v23  ;;  %v5738_v40 = vld [vmem:[#allocation11_spill] sm:$0xff]  ;;  %v2573_v59 = vadd.f32 %v5740_v30, %v2098_v19  ;;  %v5747_v23 = vld [vmem:[#allocation37_spill] sm:$0xff] }
 0x1e0   : > { %v3125_v22 = vsel %vm3061_vm11, %v3029_v8, %v3093_v46  ;;  %v2996_v43 = vadd.f32 %v3948_v60, %v2782_v48  ;;  %v2780_v16 = vadd.f32 %v2713_v58, %v2566_v35  ;;  %v3949_v1 = vpop.f32.mrf.mxu0  ;;  %v2096_v0 = vadd.f32 %v5739_v55, %v5738_v40  ;;  %v5741_v8 = vld [vmem:[#allocation12_spill] sm:$0xff]  ;;  %v5742_v60 = vld [vmem:[#allocation38_spill] sm:$0xff]  ;;  %v5743_v54 = vld [vmem:[#allocation35_spill] sm:$0xff] }
 0x1e1   : > { %3158 = vst.msk [vmem:[%s5462_s20 + $0x80] sm:$0xff] %vm3141_vm8, %v3125_v22  ;;  %vm3064_vm12 = vcmp.ge.f32.partialorder %v3032_v44, 0.0  ;;  %v3096_v27 = vmul.f32 0.01, %v3032_v44  ;;  %v3030_v6 = vadd.f32 %v5449_v3, %v2991_v12  ;;  %v3915_v42 = vpop.f32.mrf.mxu1  ;;  %v2101_v7 = vadd.f32 %v5742_v60, %v5741_v8  ;;  %v5751_v55 = vld [vmem:[#allocation42_spill] sm:$0xff] }
 0x1e2   : > { %v3035_v24 = vadd.f32 %v5449_v3, %v2996_v43  ;;  %v2994_v32 = vadd.f32 %v2927_v56, %v2780_v16  ;;  %v2783_v5 = vadd.f32 %v3915_v42, %v2569_v11  ;;  %v2930_v61 = vpop.f32.mrf.mxu0  ;;  %v2571_v46 = vadd.f32 %v5743_v54, %v2096_v0  ;;  %v5744_v11 = vld [vmem:[#allocation13_spill] sm:$0xff]  ;;  %v5746_v43 = vld [vmem:[#allocation14_spill] sm:$0xff] }
 0x1e3   : > { %v3128_v63 = vsel %vm3064_vm12, %v3032_v44, %v3096_v27  ;;  %vm3062_vm13 = vcmp.ge.f32.partialorder %v3030_v6, 0.0  ;;  %v3094_v31 = vmul.f32 0.01, %v3030_v6  ;;  %v2716_v28 = vpop.f32.mrf.mxu1  ;;  %v5745_v44 = vld [vmem:[#allocation40_spill] sm:$0xff]  ;;  %v2102_v16 = vadd.f32 %v5430_v38, %v5746_v43 }
 0x1e4   : > { %3161 = vst.msk [vmem:[%s5462_s20 + $0x98] sm:$0xff] %vm3141_vm8, %v3128_v63  ;;  %vm3067_vm14 = vcmp.ge.f32.partialorder %v3035_v24, 0.0  ;;  %v3099_v17 = vmul.f32 0.01, %v3035_v24  ;;  %v3033_v36 = vadd.f32 %v5449_v3, %v2994_v32  ;;  %v2997_v33 = vadd.f32 %v3949_v1, %v2783_v5  ;;  %v3952_v26 = vpop.f32.mrf.mxu0 }
 0x1e5   : > { %v3126_v21 = vsel %vm3062_vm13, %v3030_v6, %v3094_v31  ;;  %v2781_v51 = vadd.f32 %v2716_v28, %v2567_v2  ;;  %v3918_v4 = vpop.f32.mrf.mxu1  ;;  %v2099_v12 = vadd.f32 %v5745_v44, %v5744_v11  ;;  %v2576_v27 = vadd.f32 %v5747_v23, %v2101_v7  ;;  %v5749_v31 = vld [vmem:[#allocation39_spill] sm:$0xff] }
 0x1e6   : > { %3159 = vst.msk [vmem:[%s5462_s20 + $0x88] sm:$0xff] %vm3141_vm8, %v3126_v21  ;;  %v3131_v9 = vsel %vm3067_vm14, %v3035_v24, %v3099_v17  ;;  %vm3065_vm15 = vcmp.ge.f32.partialorder %v3033_v36, 0.0  ;;  %v3097_v49 = vmul.f32 0.01, %v3033_v36  ;;  %v3036_v20 = vadd.f32 %v5449_v3, %v2997_v33  ;;  %v2943_v14 = vpop.f32.mrf.mxu0  ;;  %v5748_v24 = vld [vmem:[#allocation15_spill] sm:$0xff]  ;;  %v5750_v17 = vld [vmem:[#allocation41_spill] sm:$0xff] }
 0x1e7   : > { %3164 = vst.msk [vmem:[%s5462_s20 + $0xb0] sm:$0xff] %vm3141_vm8, %v3131_v9  ;;  %v2995_v35 = vadd.f32 %v2930_v61, %v2781_v51  ;;  %v2786_v18 = vadd.f32 %v3918_v4, %v2572_v34  ;;  %v2729_v50 = vpop.f32.mrf.mxu1  ;;  %v2100_v32 = vadd.f32 %v5435_v53, %v5748_v24  ;;  %v2574_v28 = vadd.f32 %v5749_v31, %v2099_v12 }
 0x1e8   : > { %v3129_v25 = vsel %vm3065_vm15, %v3033_v36, %v3097_v49  ;;  %vm3068_vm0 = vcmp.ge.f32.partialorder %v3036_v20, 0.0  ;;  %v3100_v37 = vmul.f32 0.01, %v3036_v20  ;;  %v2784_v39 = vadd.f32 %v2729_v50, %v2570_v45  ;;  %v3953_v52 = vpop.f32.mrf.mxu0 }
 0x1e9   : > { %3162 = vst.msk [vmem:[%s5462_s20 + $0xa0] sm:$0xff] %vm3141_vm8, %v3129_v25  ;;  %v3034_v48 = vadd.f32 %v5449_v3, %v2995_v35  ;;  %v3000_v56 = vadd.f32 %v3952_v26, %v2786_v18  ;;  %v3919_v15 = vpop.f32.mrf.mxu1  ;;  %v2577_v36 = vadd.f32 %v5750_v17, %v2102_v16  ;;  %v2575_v0 = vadd.f32 %v5751_v55, %v2100_v32 }
 0x1ea   : > { %v3132_v58 = vsel %vm3068_vm0, %v3036_v20, %v3100_v37  ;;  %v2998_v13 = vadd.f32 %v2943_v14, %v2784_v39  ;;  %v2787_v2 = vadd.f32 %v3919_v15, %v2573_v59  ;;  %v2946_v22 = vpop.f32.mrf.mxu0 }
 0x1eb   : > { %3165 = vst.msk [vmem:[%s5462_s20 + $0xb8] sm:$0xff] %vm3141_vm8, %v3132_v58  ;;  %vm3066_vm1 = vcmp.ge.f32.partialorder %v3034_v48, 0.0  ;;  %v3098_v1 = vmul.f32 0.01, %v3034_v48  ;;  %v3039_v57 = vadd.f32 %v5449_v3, %v3000_v56  ;;  %v2732_v41 = vpop.f32.mrf.mxu1 }
 0x1ec   : > { %v3037_v6 = vadd.f32 %v5449_v3, %v2998_v13  ;;  %v3001_v42 = vadd.f32 %v3953_v52, %v2787_v2  ;;  %v2785_v47 = vadd.f32 %v2732_v41, %v2571_v46  ;;  %v3956_v34 = vpop.f32.mrf.mxu0 }
 0x1ed   : > { %v3130_v38 = vsel %vm3066_vm1, %v3034_v48, %v3098_v1  ;;  %vm3071_vm2 = vcmp.ge.f32.partialorder %v3039_v57, 0.0  ;;  %v3103_v5 = vmul.f32 0.01, %v3039_v57  ;;  %v3922_v61 = vpop.f32.mrf.mxu1 }
 0x1ee   : > { %3163 = vst.msk [vmem:[%s5462_s20 + $0xa8] sm:$0xff] %vm3141_vm8, %v3130_v38  ;;  %vm3069_vm3 = vcmp.ge.f32.partialorder %v3037_v6, 0.0  ;;  %v3101_v29 = vmul.f32 0.01, %v3037_v6  ;;  %v3040_v10 = vadd.f32 %v5449_v3, %v3001_v42  ;;  %v2999_v19 = vadd.f32 %v2946_v22, %v2785_v47  ;;  %v2959_v63 = vpop.f32.mrf.mxu0 }
 0x1ef   : > { %v3135_v33 = vsel %vm3071_vm2, %v3039_v57, %v3103_v5  ;;  %v2790_v53 = vadd.f32 %v3922_v61, %v2576_v27  ;;  %v2745_v26 = vpop.f32.mrf.mxu1 }
 0x1f0   : > { %3168 = vst.msk [vmem:[%s5462_s20 + $0xd0] sm:$0xff] %vm3141_vm8, %v3135_v33  ;;  %v3133_v62 = vsel %vm3069_vm3, %v3037_v6, %v3101_v29  ;;  %vm3072_vm4 = vcmp.ge.f32.partialorder %v3040_v10, 0.0  ;;  %v3104_v45 = vmul.f32 0.01, %v3040_v10  ;;  %v3038_v40 = vadd.f32 %v5449_v3, %v2999_v19  ;;  %v3957_v9 = vpop.f32.mrf.mxu0 }
 0x1f1   : > { %3166 = vst.msk [vmem:[%s5462_s20 + $0xc0] sm:$0xff] %vm3141_vm8, %v3133_v62  ;;  %v3004_v21 = vadd.f32 %v3956_v34, %v2790_v53  ;;  %v2788_v51 = vadd.f32 %v2745_v26, %v2574_v28  ;;  %v3923_v4 = vpop.f32.mrf.mxu1 }
 0x1f2   : > { %v3136_v49 = vsel %vm3072_vm4, %v3040_v10, %v3104_v45  ;;  %vm3070_vm5 = vcmp.ge.f32.partialorder %v3038_v40, 0.0  ;;  %v3102_v20 = vmul.f32 0.01, %v3038_v40  ;;  %v2791_v14 = vadd.f32 %v3923_v4, %v2577_v36  ;;  %v2962_v25 = vpop.f32.mrf.mxu0 }
 0x1f3   : > { %3169 = vst.msk [vmem:[%s5462_s20 + $0xd8] sm:$0xff] %vm3141_vm8, %v3136_v49  ;;  %v3043_v30 = vadd.f32 %v5449_v3, %v3004_v21  ;;  %v3002_v59 = vadd.f32 %v2959_v63, %v2788_v51  ;;  %v2748_v8 = vpop.f32.mrf.mxu1 }
 0x1f4   : > { %v3134_v60 = vsel %vm3070_vm5, %v3038_v40, %v3102_v20  ;;  %v3005_v7 = vadd.f32 %v3957_v9, %v2791_v14  ;;  %v2789_v35 = vadd.f32 %v2748_v8, %v2575_v0 }
 0x1f5   : > { %3167 = vst.msk [vmem:[%s5462_s20 + $0xc8] sm:$0xff] %vm3141_vm8, %v3134_v60  ;;  %vm3075_vm6 = vcmp.ge.f32.partialorder %v3043_v30, 0.0  ;;  %v3107_v18 = vmul.f32 0.01, %v3043_v30  ;;  %v3041_v50 = vadd.f32 %v5449_v3, %v3002_v59 }
 0x1f6   : > { %v3044_v37 = vadd.f32 %v5449_v3, %v3005_v7  ;;  %v3003_v39 = vadd.f32 %v2962_v25, %v2789_v35 }
 0x1f7   : > { %v3139_v52 = vsel %vm3075_vm6, %v3043_v30, %v3107_v18  ;;  %vm3073_vm7 = vcmp.ge.f32.partialorder %v3041_v50, 0.0  ;;  %v3105_v54 = vmul.f32 0.01, %v3041_v50 }
 0x1f8   : > { %3172 = vst.msk [vmem:[%s5462_s20 + $0xf0] sm:$0xff] %vm3141_vm8, %v3139_v52  ;;  %vm3076_vm9 = vcmp.ge.f32.partialorder %v3044_v37, 0.0  ;;  %v3108_v46 = vmul.f32 0.01, %v3044_v37  ;;  %v3042_v48 = vadd.f32 %v5449_v3, %v3003_v39 }
 0x1f9   : > { %v3137_v56 = vsel %vm3073_vm7, %v3041_v50, %v3105_v54 }
 0x1fa   : > { %3170 = vst.msk [vmem:[%s5462_s20 + $0xe0] sm:$0xff] %vm3141_vm8, %v3137_v56  ;;  %v3140_v15 = vsel %vm3076_vm9, %v3044_v37, %v3108_v46  ;;  %vm3074_vm10 = vcmp.ge.f32.partialorder %v3042_v48, 0.0  ;;  %v3106_v11 = vmul.f32 0.01, %v3042_v48 }
 0x1fb   : > { %3173 = vst.msk [vmem:[%s5462_s20 + $0xf8] sm:$0xff] %vm3141_vm8, %v3140_v15 }
 0x1fc   : > { %v3138_v44 = vsel %vm3074_vm10, %v3042_v48, %v3106_v11 }
 0x1fd   : > { %3171 = vst.msk [vmem:[%s5462_s20 + $0xe8] sm:$0xff] %vm3141_vm8, %v3138_v44 }
 0x1fe PF: > { %s13_s14 = sadd.s32 1, %s4037_s14   ;;  %s5752_s12 = smov %s4033_s13 }
 0x1ff   : > { %p10_p5 = scmp.ge.s32.totalorder %s13_s14, 4   ;;  %s5753_s13 = smov %s5755_s15 }
 0x201   :  { %12 = sbr.rel (!%p10_p5) target bundleno = 2 (0x2), region = 71 }

</bundles_post_ra>
